<compile_context>
chip_gen: v7x
topology: tpu7x:2x2x1
jax: 0.10.0
libtpu: 0.0.40
codegen_flags: <defaults>
</compile_context>

<pallas_src>
import functools

import jax
import jax.numpy as jnp
from jax.experimental import pallas as pl
from jax.experimental.pallas import tpu as pltpu

VGG16_CFG = [64, 64, 'M', 128, 128, 'M', 256, 256, 256, 'M',
             512, 512, 512, 'M', 512, 512, 512, 'M']
BN_EPS = 1e-5


def conv_plan(cfg):
    """Turn the VGG cfg into a list of (out_channels, fuse_pool) conv layers."""
    plan = []
    i = 0
    while i < len(cfg):
        assert cfg[i] != 'M', "unexpected standalone 'M' in cfg"
        pool = (i + 1 < len(cfg)) and (cfg[i + 1] == 'M')
        plan.append((cfg[i], pool))
        i += 2 if pool else 1
    return plan


# ---------------------------------------------------------------------------
# Generic fused Conv3x3 + folded BatchNorm + ReLU (+ optional 2x2 max-pool).
# One grid step processes NB images and a T-wide Cout tile:
#   * large-spatial layers (H >= 16): NB = 1, T = Cout, grid = (N, 1)
#   * small-spatial layers (H <= 8):  NB = N, T = 128,  grid = (1, Cout//128)
# ---------------------------------------------------------------------------
def _conv_bn_relu_kernel(x_ref, w_ref, s_ref, b_ref, o_ref, pad_ref, patch_ref,
                         *, NB, H, W, Cin, T, pool):
    # x_ref    : (NB, H, W, Cin)        bf16 input tile (full batch if packed)
    # w_ref    : (9*Cin, T)             bf16 weights, rows ordered (kh, kw, cin)
    # s_ref    : (1, T)                 f32 folded BN scale
    # b_ref    : (1, T)                 f32 folded BN bias
    # o_ref    : (NB, Ho, Wo, T)        bf16 output tile
    # pad_ref  : (NB, H+2, W+2, Cin)    bf16 VMEM scratch (zero halo)
    # patch_ref: (NB*H*W, 9*Cin)        bf16 VMEM scratch (im2col patch)
    M = NB * H * W

    # Zero ONLY the halo edges (cheap; done every step so it is safe when the
    # grid is sharded across TensorCores).  The interior is fully overwritten.
    zr = jnp.zeros((NB, 1, W + 2, Cin), jnp.bfloat16)
    pad_ref[:, 0:1, :, :] = zr
    pad_ref[:, H + 1:H + 2, :, :] = zr
    zc = jnp.zeros((NB, H + 2, 1, Cin), jnp.bfloat16)
    pad_ref[:, :, 0:1, :] = zc
    pad_ref[:, :, W + 1:W + 2, :] = zc
    pad_ref[:, 1:H + 1, 1:W + 1, :] = x_ref[...]

    # Build the im2col patch: each (kh, kw) tap is written straight into its
    # K-slice of the scratch (no concatenate, no intermediate copies).
    for kh in range(3):
        for kw in range(3):
            t = kh * 3 + kw
            patch_ref[:, t * Cin:(t + 1) * Cin] = (
                pad_ref[:, kh:kh + H, kw:kw + W, :].reshape(M, Cin))

    # One MXU matmul: (M, 9*Cin) @ (9*Cin, T), f32 accumulation.
    acc = jnp.dot(patch_ref[...], w_ref[...],
                  preferred_element_type=jnp.float32)

    # Folded BN + ReLU in f32, then cast to bf16 BEFORE the pool relayouts
    # (bit-identical: max commutes with the monotonic rounding).
    y = jnp.maximum(acc * s_ref[...] + b_ref[...], 0.0).astype(jnp.bfloat16)

    if pool:
        # Fused 2x2 stride-2 max-pool via reshape + lane-half maxima.
        y = y.reshape(M // 2, 2 * T)
        y = jnp.maximum(y[:, :T], y[:, T:])          # pair along w
        half = (W // 2) * T
        y = y.reshape(NB * H // 2, 2 * half)
        y = jnp.maximum(y[:, :half], y[:, half:])    # pair along h
        o_ref[...] = y.reshape(NB, H // 2, W // 2, T).astype(o_ref.dtype)
    else:
        o_ref[...] = y.reshape(NB, H, W, T).astype(o_ref.dtype)


def conv_bn_relu(x, wk, scale, bias, *, pool):
    # x: (N, H, W, Cin) bf16; wk: (9*Cin, Cout) bf16; scale/bias: (1, Cout) f32
    N, H, W, Cin = x.shape
    K, Cout = wk.shape
    if H <= 8:
        NB, T = N, min(128, Cout)     # pack batch, tile Cout (v7x gets >1 step)
    else:
        NB, T = 1, Cout               # per-image; M = H*W already >= 256
    grid = (N // NB, Cout // T)
    Ho, Wo = (H // 2, W // 2) if pool else (H, W)
    kernel = functools.partial(_conv_bn_relu_kernel,
                               NB=NB, H=H, W=W, Cin=Cin, T=T, pool=pool)
    return pl.pallas_call(
        kernel,
        out_shape=jax.ShapeDtypeStruct((N, Ho, Wo, Cout), jnp.bfloat16),
        grid_spec=pltpu.PrefetchScalarGridSpec(
            num_scalar_prefetch=0,
            grid=grid,
            in_specs=[
                pl.BlockSpec((NB, H, W, Cin), lambda n, j: (n, 0, 0, 0)),
                pl.BlockSpec((K, T), lambda n, j: (0, j)),
                pl.BlockSpec((1, T), lambda n, j: (0, j)),
                pl.BlockSpec((1, T), lambda n, j: (0, j)),
            ],
            out_specs=pl.BlockSpec((NB, Ho, Wo, T), lambda n, j: (n, 0, 0, j)),
            scratch_shapes=[
                pltpu.VMEM((NB, H + 2, W + 2, Cin), jnp.bfloat16),
                pltpu.VMEM((NB * H * W, K), jnp.bfloat16),
            ],
        ),
        compiler_params=pltpu.CompilerParams(
            dimension_semantics=("parallel", "parallel"),
            vmem_limit_bytes=32 * 1024 * 1024),   # worst case well under 8 MiB
    )(x, wk, scale, bias)


# ---------------------------------------------------------------------------
# First layer (Cin=3): the im2col patch is built in the wrapper (tiny, pure
# data movement), so the kernel is a single K=27 matmul + BN + ReLU.
# ---------------------------------------------------------------------------
def _patch_matmul_bn_relu_kernel(p_ref, w_ref, s_ref, b_ref, o_ref, *, H, W, Cout):
    acc = jnp.dot(p_ref[0], w_ref[...], preferred_element_type=jnp.float32)
    y = jnp.maximum(acc * s_ref[...] + b_ref[...], 0.0)
    o_ref[...] = y.reshape(1, H, W, Cout).astype(o_ref.dtype)


def im2col_3x3(x):
    # x: (N, H, W, C) -> (N, H*W, 9*C), tap order (kh, kw, c).  Only used for
    # the tiny first layer (C=3); done in XLA to avoid lane-padded halos.
    N, H, W, C = x.shape
    xp = jnp.pad(x, ((0, 0), (1, 1), (1, 1), (0, 0)))
    taps = [xp[:, kh:kh + H, kw:kw + W, :] for kh in range(3) for kw in range(3)]
    return jnp.concatenate(taps, axis=-1).reshape(N, H * W, 9 * C)


def first_conv_bn_relu(patch, wk, scale, bias, *, H, W):
    # patch: (N, H*W, 27) bf16; wk: (27, Cout) bf16
    N, M, K = patch.shape
    Cout = wk.shape[1]
    kernel = functools.partial(_patch_matmul_bn_relu_kernel, H=H, W=W, Cout=Cout)
    return pl.pallas_call(
        kernel,
        out_shape=jax.ShapeDtypeStruct((N, H, W, Cout), jnp.bfloat16),
        grid_spec=pltpu.PrefetchScalarGridSpec(
            num_scalar_prefetch=0,
            grid=(N,),
            in_specs=[
                pl.BlockSpec((1, M, K), lambda n: (n, 0, 0)),
                pl.BlockSpec((K, Cout), lambda n: (0, 0)),
                pl.BlockSpec((1, Cout), lambda n: (0, 0)),
                pl.BlockSpec((1, Cout), lambda n: (0, 0)),
            ],
            out_specs=pl.BlockSpec((1, H, W, Cout), lambda n: (n, 0, 0, 0)),
        ),
        compiler_params=pltpu.CompilerParams(
            dimension_semantics=("parallel",),
            vmem_limit_bytes=32 * 1024 * 1024),
    )(patch, wk, scale, bias)


# ---------------------------------------------------------------------------
# Linear classifier kernel (bf16 operands, f32 accumulation / output)
# ---------------------------------------------------------------------------
def _linear_kernel(x_ref, w_ref, b_ref, o_ref):
    o_ref[...] = jnp.dot(x_ref[...], w_ref[...],
                         preferred_element_type=jnp.float32) + b_ref[...]


def linear(x, wk, b):
    N = x.shape[0]
    Cout = wk.shape[1]
    return pl.pallas_call(
        _linear_kernel,
        out_shape=jax.ShapeDtypeStruct((N, Cout), jnp.float32),
    )(x, wk, b)


# ---------------------------------------------------------------------------
# Parameters (deterministic synthetic init; BN folded in eval mode)
# ---------------------------------------------------------------------------
def init_params(key):
    conv_params = []
    in_c = 3
    for out_c, pool in conv_plan(VGG16_CFG):
        key, kw_, kg, kb, km, kv = jax.random.split(key, 6)
        fan_in = in_c * 9
        w = jax.random.normal(kw_, (3, 3, in_c, out_c), jnp.float32) * \
            jnp.sqrt(2.0 / fan_in)
        gamma = 1.0 + 0.1 * jax.random.normal(kg, (out_c,), jnp.float32)
        beta = 0.1 * jax.random.normal(kb, (out_c,), jnp.float32)
        rmean = 0.1 * jax.random.normal(km, (out_c,), jnp.float32)
        rvar = 1.0 + 0.1 * jax.random.uniform(kv, (out_c,), jnp.float32)
        # Fold BatchNorm2d (eval mode, running stats) into a per-channel affine.
        scale = gamma / jnp.sqrt(rvar + BN_EPS)
        bias = beta - rmean * scale
        conv_params.append(dict(
            w=w,                                                   # f32 HWIO (reference)
            wk=w.reshape(9 * in_c, out_c).astype(jnp.bfloat16),    # (kh,kw,cin)-major
            scale=scale.reshape(1, out_c),
            bias=bias.reshape(1, out_c),
            pool=pool,
        ))
        in_c = out_c
    key, kw_, kb = jax.random.split(key, 3)
    w_fc = jax.random.normal(kw_, (512, 10), jnp.float32) * jnp.sqrt(1.0 / 512)
    b_fc = 0.01 * jax.random.normal(kb, (1, 10), jnp.float32)
    fc_params = dict(w=w_fc, wk=w_fc.astype(jnp.bfloat16), b=b_fc)
    return conv_params, fc_params


# ---------------------------------------------------------------------------
# Forward pass (Pallas) and pure-JAX f32 reference
# ---------------------------------------------------------------------------
def vggnet_forward(x_nchw, conv_params, fc_params):
    x = jnp.transpose(x_nchw, (0, 2, 3, 1)).astype(jnp.bfloat16)  # NCHW -> NHWC
    H, W = x.shape[1], x.shape[2]
    p0 = conv_params[0]
    assert not p0['pool']
    x = first_conv_bn_relu(im2col_3x3(x), p0['wk'], p0['scale'], p0['bias'],
                           H=H, W=W)
    for p in conv_params[1:]:
        x = conv_bn_relu(x, p['wk'], p['scale'], p['bias'], pool=p['pool'])
    # nn.AvgPool2d(kernel_size=1, stride=1) is an identity op -> elided.
    N = x.shape[0]
    x = x.reshape(N, -1)  # (N, 1, 1, 512) -> (N, 512)
    return linear(x, fc_params['wk'], fc_params['b'])


def vggnet_reference(x_nchw, conv_params, fc_params):
    x = jnp.transpose(x_nchw, (0, 2, 3, 1)).astype(jnp.float32)
    for p in conv_params:
        x = jax.lax.conv_general_dilated(
            x, p['w'], window_strides=(1, 1), padding='SAME',
            dimension_numbers=('NHWC', 'HWIO', 'NHWC'),
            precision=jax.lax.Precision.HIGHEST)
        x = jnp.maximum(x * p['scale'].reshape(1, 1, 1, -1)
                        + p['bias'].reshape(1, 1, 1, -1), 0.0)
        if p['pool']:
            x = jax.lax.reduce_window(x, -jnp.inf, jax.lax.max,
                                      (1, 2, 2, 1), (1, 2, 2, 1), 'VALID')
    return x.reshape(x.shape[0], -1) @ fc_params['w'] + fc_params['b']


if __name__ == "__main__":
    key = jax.random.PRNGKey(0)
    key, kx = jax.random.split(key)
    # CIFAR-10 style NCHW input (32x32 is required so the flatten produces 512
    # features, matching nn.Linear(512, 10)).
    x = jax.random.normal(kx, (2, 3, 32, 32), jnp.float32)
    conv_params, fc_params = init_params(key)

    out = jax.block_until_ready(vggnet_forward(x, conv_params, fc_params))
    ref = jax.block_until_ready(vggnet_reference(x, conv_params, fc_params))

    assert out.shape == (2, 10), out.shape
    assert out.dtype == jnp.float32
    assert jnp.allclose(out, ref, rtol=5e-2, atol=5e-2), (out, ref)
    print("KERNEL_OK")
</pallas_src>

<mosaic_0001>
module attributes {stable_mosaic.version = 11 : i64} {
  func.func @_patch_matmul_bn_relu_kernel(%arg0: i32, %arg1: memref<1x1024x27xbf16, #tpu.memory_space<vmem>>, %arg2: memref<27x64xbf16, #tpu.memory_space<vmem>>, %arg3: memref<1x64xf32, #tpu.memory_space<vmem>>, %arg4: memref<1x64xf32, #tpu.memory_space<vmem>>, %arg5: memref<1x32x32x64xbf16, #tpu.memory_space<vmem>>) attributes {dimension_semantics = [#tpu.dimension_semantics<parallel>], iteration_bounds = array<i64: 2>, scalar_prefetch = 0 : i64, scratch_operands = 0 : i64, tpu.core_type = #tpu.core_type<tc>, window_params = [{transform_indices = @transform_0, window_bounds = array<i64: 1, 1024, 27>}, {pipeline_mode = #tpu.pipeline_mode<synchronous>, transform_indices = @transform_1, window_bounds = array<i64: 27, 64>}, {pipeline_mode = #tpu.pipeline_mode<synchronous>, transform_indices = @transform_2, window_bounds = array<i64: 1, 64>}, {pipeline_mode = #tpu.pipeline_mode<synchronous>, transform_indices = @transform_3, window_bounds = array<i64: 1, 64>}, {transform_indices = @transform_4, window_bounds = array<i64: 1, 32, 32, 64>}]} {
    %c0 = arith.constant 0 : index
    %c0_0 = arith.constant 0 : index
    %c0_1 = arith.constant 0 : index
    %0 = vector.load %arg1[%c0, %c0_0, %c0_1] : memref<1x1024x27xbf16, #tpu.memory_space<vmem>>, vector<1x1024x27xbf16>
    %1 = vector.shape_cast %0 : vector<1x1024x27xbf16> to vector<1024x27xbf16>
    %c0_2 = arith.constant 0 : index
    %c0_3 = arith.constant 0 : index
    %2 = vector.load %arg2[%c0_2, %c0_3] : memref<27x64xbf16, #tpu.memory_space<vmem>>, vector<27x64xbf16>
    %cst = arith.constant dense<0.000000e+00> : vector<1024x64xf32>
    %3 = tpu.matmul %1, %2, %cst {dimension_numbers = #tpu.dot_dimension_numbers<[1], [0], [0], [1], [0, 0, 1, 1], [], []>} : vector<1024x27xbf16>, vector<27x64xbf16>, vector<1024x64xf32> -> vector<1024x64xf32>
    %c0_4 = arith.constant 0 : index
    %c0_5 = arith.constant 0 : index
    %4 = vector.load %arg3[%c0_4, %c0_5] : memref<1x64xf32, #tpu.memory_space<vmem>>, vector<1x64xf32>
    %5 = vector.broadcast %4 : vector<1x64xf32> to vector<1024x64xf32>
    %6 = arith.mulf %3, %5 : vector<1024x64xf32>
    %c0_6 = arith.constant 0 : index
    %c0_7 = arith.constant 0 : index
    %7 = vector.load %arg4[%c0_6, %c0_7] : memref<1x64xf32, #tpu.memory_space<vmem>>, vector<1x64xf32>
    %8 = vector.broadcast %7 : vector<1x64xf32> to vector<1024x64xf32>
    %9 = arith.addf %6, %8 : vector<1024x64xf32>
    %cst_8 = arith.constant 0.000000e+00 : f32
    %10 = vector.broadcast %cst_8 : f32 to vector<1024x64xf32>
    %11 = arith.maximumf %9, %10 : vector<1024x64xf32>
    %12 = vector.shape_cast %11 : vector<1024x64xf32> to vector<1x32x32x64xf32>
    %13 = arith.truncf %12 : vector<1x32x32x64xf32> to vector<1x32x32x64xbf16>
    %c0_9 = arith.constant 0 : index
    %c0_10 = arith.constant 0 : index
    %c0_11 = arith.constant 0 : index
    %c0_12 = arith.constant 0 : index
    %14 = vector.load %arg5[%c0_9, %c0_10, %c0_11, %c0_12] : memref<1x32x32x64xbf16, #tpu.memory_space<vmem>>, vector<1x32x32x64xbf16>
    tpu.vector_store %arg5[%c0_9, %c0_10, %c0_11, %c0_12], %13 {strides = array<i32>} : memref<1x32x32x64xbf16, #tpu.memory_space<vmem>>, vector<1x32x32x64xbf16>,
    return
  }
  func.func @transform_0(%arg0: i32) -> (i32, i32, i32) {
    %c0_i32 = arith.constant 0 : i32
    %c0_i32_0 = arith.constant 0 : i32
    %c0_i32_1 = arith.constant 0 : i32
    return %arg0, %c0_i32, %c0_i32_0 : i32, i32, i32
  }
  func.func @transform_1(%arg0: i32) -> (i32, i32) {
    %c0_i32 = arith.constant 0 : i32
    %c0_i32_0 = arith.constant 0 : i32
    %c0_i32_1 = arith.constant 0 : i32
    return %c0_i32, %c0_i32_0 : i32, i32
  }
  func.func @transform_2(%arg0: i32) -> (i32, i32) {
    %c0_i32 = arith.constant 0 : i32
    %c0_i32_0 = arith.constant 0 : i32
    %c0_i32_1 = arith.constant 0 : i32
    return %c0_i32, %c0_i32_0 : i32, i32
  }
  func.func @transform_3(%arg0: i32) -> (i32, i32) {
    %c0_i32 = arith.constant 0 : i32
    %c0_i32_0 = arith.constant 0 : i32
    %c0_i32_1 = arith.constant 0 : i32
    return %c0_i32, %c0_i32_0 : i32, i32
  }
  func.func @transform_4(%arg0: i32) -> (i32, i32, i32, i32) {
    %c0_i32 = arith.constant 0 : i32
    %c0_i32_0 = arith.constant 0 : i32
    %c0_i32_1 = arith.constant 0 : i32
    %c0_i32_2 = arith.constant 0 : i32
    return %arg0, %c0_i32, %c0_i32_0, %c0_i32_1 : i32, i32, i32, i32
  }
}

</mosaic_0001>

<bundles_post_ra>
// kernel: tpu_custom_call.1
= control target key start
LH: loop header
LB: loop body
LE: loop exit
PB: predicated region body
PF: predicated region fallthrough
CT: control target
= control target key end

     0   :  { %9 = vsyncpa [#allocation3], 0  ;;  %s4105_s0 = inlined_call_operand.vmem [shape: bf16[2,1024,27], index: 0, kind: input, shape index: {}]   ;;  %s4106_s1 = inlined_call_operand.vmem [shape: bf16[27,64], index: 1, kind: input, shape index: {}]   ;;  %s4107_s2 = inlined_call_operand.vmem [shape: f32[1,64], index: 2, kind: input, shape index: {}]   ;;  %s4108_s3 = inlined_call_operand.vmem [shape: f32[1,64], index: 3, kind: input, shape index: {}]   ;;  %s4109_s4 = inlined_call_operand.hbm [shape: bf16[2,32,32,64], index: 4, kind: output, shape index: {}]  }
   0x1   :  { %11 = vsyncpa [#allocation3 + $0x1], 0  ;;  %s3327_s15 = smov 0   ;;  %s3329_s16 = smov 0  }
   0x2   :  { %s3331_s17 = smov 0   ;;  %s3333_s18 = smov 0  }
   0x3 LB: > { %s3348_s19 = sadd.s32 4294967295, %s3296_s18   ;;  %s2520_s20 = sadd.s32 4294967294, %s3296_s18   ;;  %s3296_s18 = sphi %s3333_s18, %s4115_s18   ;;  %s3292_s17 = sphi %s3331_s17, %s4114_s17   ;;  %s3288_s16 = sphi %s3329_s16, %s4113_s16   ;;  %s3284_s15 = sphi %s3327_s15, %s4112_s15  }
   0x4   : > { %s3352_s21 = sadd.s32 1, %s3296_s18   ;;  %s113_s22 = sadd.s32 1, %s3292_s17 }
   0x5   : > { %s110_s23 = ssub.s32 %s3296_s18, %s3352_s21  ;;  %p123_p0 = scmp.ne.s32.totalorder %s3292_s17, %s3288_s16 }
   0x6   : > { %p111_p1 = scmp.eq.s32.totalorder %s110_s23, 0  ;;  %p124_p2 = scmp.eq.s32.totalorder %s3348_s19, 1 }
   0x7   : > { %p129_p3 = scmp.ne.s32.totalorder %s3288_s16, %s3284_s15  ;;  %p130_p4 = scmp.eq.s32.totalorder %s2520_s20, 1 }
   0x8   : > { %s3363_s24 = scalar_select %p111_p1, %s3292_s17, %s113_s22  }
   0x9   : > { %p3365_p5 = por %p124_p2, %p123_p0  ;;  %p3369_p6 = por %p130_p4, %p129_p3 }
   0xa   : > { %p2523_p7 = scmp.ge.s32.totalorder %s3296_s18, 1  ;;  %p165_p8 = scmp.lt.s32.totalorder %s3296_s18, 3 }
   0xc   : > { %p166_p9 = pnand %p2523_p7, %p165_p8 }
   0xd   : > { %v3166_v0 = vld [vmem:[%s4106_s1] sm:$0xff] (!%p166_p9)   ;;  %vm853_vm0 = vcmask (!%p166_p9), 1044480   ;;  %v3167_v1 = vld [vmem:[%s4106_s1 + $0x8] sm:$0x3f] (!%p166_p9)   ;;  %vm854_vm1 = vcmask (!%p166_p9), 1045504   ;;  %p191_p10 = scmp.lt.s32.totalorder (!%p166_p9), %s3348_s19, 1 }
   0xe   : > { %169 = sbr.rel (%p166_p9) target bundleno = 389 (0x185), region = 36  ;;  %2988 = vmatprep.subr.bf16.mxu0 (!%p166_p9), %v3166_v0  ;;  %3120 = vmatprep.subr.bf16.mxu1 (!%p166_p9), %v3166_v0  ;;  %v3298_v2 = vmov (!%p166_p9), 65535   ;;  %vm660_vm2 = vcmask (!%p166_p9), 220160   ;;  %s188_s12 = sand.u32 (!%p166_p9), 1, %s3288_s16   ;;  %vm2315_vm3 = vcmask (!%p166_p9), 519168  }
   0xf   : > { %2989 = vmatpush3.bf16.msra.mxu0 (!%p166_p9), %v3166_v0  ;;  %3122 = vmatpush3.bf16.msra.mxu1 (!%p166_p9), %v3166_v0  ;;  %v855_v3 = vsel (!%p166_p9), %vm853_vm0, 4294967295, %v3298_v2  ;;  %s2524_s20 = sshll.u32 (!%p166_p9), %s188_s12, 9  ;;  %s2921_s30 = sshll.u32 (!%p166_p9), %s3348_s19, 13 }
  0x10   : > { %v856_v4 = vsel (!%p166_p9), %vm854_vm1, %v855_v3, 0  ;;  %s3545_s22 = scalar_lea.vmem (!%p166_p9), [#allocation2], %s2524_s20  ;;  %s4048_s7 = scalar_lea.hbm (!%p166_p9), %s4109_s4, %s2921_s30 }
  0x11   : > { %v858_v5 = vand.u32 (!%p166_p9), %v3167_v1, %v856_v4  ;;  %s4064_s8 = scalar_lea.sflag (!%p166_p9), [#allocation3], %s188_s12  ;;  %s3299_s10 = smov (!%p166_p9), [#allocation2]  }
  0x12   : > { %s3238_s11 = sshll.u32 (!%p166_p9), %s3299_s10, 4  ;;  %s3239_s11 = int_to_ptr.vmem [resolvable:$false] %s3238_s11 }
  0x13   : > { %2990 = vmatprep.subr.bf16.mxu0 (!%p166_p9), %v858_v5  ;;  %3121 = vmatprep.subr.bf16.mxu1 (!%p166_p9), %v858_v5  ;;  %s3240_s13 = scalar_lea.vmem (!%p166_p9), %s3239_s11, 16384 }
  0x14   : > { %2991 = vmatpush3.bf16.msra.mxu0 (!%p166_p9), %v858_v5  ;;  %3123 = vmatpush3.bf16.msra.mxu1 (!%p166_p9), %v858_v5 }
  0x15   : > { %s192_s5 = scalar_select %p191_p10, %s3348_s19, 1 }
  0x17   : > { %s2792_s6 = sshll.u32 %s192_s5, 9  ;;  %s2458_s5 = sshll.u32 %s3545_s22, 4  ;;  %s4050_s5 = int_to_ptr.vmem [resolvable:$true] %s2458_s5 }
  0x18   : > { %s3386_s9 = scalar_lea.vmem %s4105_s0, %s2792_s6  ;;  %p3241_p0 = scmp.lt.s32.totalorder %s4050_s5, %s3239_s11 }
  0x19   : > { %v3168_v6 = vld [vmem:[%s3386_s9] sm:$0xff]   ;;  %v3170_v8 = vld [vmem:[%s3386_s9 + $0x8] sm:$0xff]   ;;  %v3172_v10 = vld [vmem:[%s3386_s9 + $0x10] sm:$0xff]  }
  0x1a   : > { %v3169_v7 = vld [vmem:[%s3386_s9 + $0x100] sm:$0xff]   ;;  %2992 = vmatprep.mubr.msk.bf16.mxu0 %vm660_vm2, %v3168_v6  ;;  %v3171_v9 = vld [vmem:[%s3386_s9 + $0x108] sm:$0xff]   ;;  %v3173_v11 = vld [vmem:[%s3386_s9 + $0x110] sm:$0xff]  }
  0x1b   : > { %3056 = vmatprep.mubr.msk.bf16.mxu1 %vm660_vm2, %v3169_v7  ;;  %2993 = vmatmul.mubr.msk.bf16.vlgmr.msra.gmra.mrb[0].mxu0 %vm660_vm2, %v3170_v8  ;;  %v3174_v12 = vld [vmem:[%s3386_s9 + $0x18] sm:$0xff]   ;;  %v3176_v14 = vld [vmem:[%s3386_s9 + $0x20] sm:$0xff]   ;;  %v3178_v16 = vld [vmem:[%s3386_s9 + $0x28] sm:$0xff]  }
  0x1c   : > { %3057 = vmatmul.mubr.msk.bf16.vlgmr.msra.gmra.mrb[0].mxu1 %vm660_vm2, %v3171_v9  ;;  %2996 = vmatprep.mubr.msk.bf16.mxu0 %vm660_vm2, %v3172_v10  ;;  %v3175_v13 = vld [vmem:[%s3386_s9 + $0x118] sm:$0xff]   ;;  %v3177_v15 = vld [vmem:[%s3386_s9 + $0x120] sm:$0xff]   ;;  %v3179_v17 = vld [vmem:[%s3386_s9 + $0x128] sm:$0xff]  }
  0x1d   : > { %3060 = vmatprep.mubr.msk.bf16.mxu1 %vm660_vm2, %v3173_v11  ;;  %v3180_v18 = vld [vmem:[%s3386_s9 + $0x30] sm:$0xff]   ;;  %v3182_v20 = vld [vmem:[%s3386_s9 + $0x38] sm:$0xff]   ;;  %v3184_v22 = vld [vmem:[%s3386_s9 + $0x40] sm:$0xff]  }
  0x1e   : > { %v3181_v19 = vld [vmem:[%s3386_s9 + $0x130] sm:$0xff]   ;;  %v3183_v21 = vld [vmem:[%s3386_s9 + $0x138] sm:$0xff]   ;;  %v3185_v23 = vld [vmem:[%s3386_s9 + $0x140] sm:$0xff]  }
  0x1f   : > { %v3186_v24 = vld [vmem:[%s3386_s9 + $0x48] sm:$0xff]   ;;  %v3188_v26 = vld [vmem:[%s3386_s9 + $0x50] sm:$0xff]   ;;  %v3190_v28 = vld [vmem:[%s3386_s9 + $0x58] sm:$0xff]  }
  0x20   : > { %v3187_v25 = vld [vmem:[%s3386_s9 + $0x148] sm:$0xff]   ;;  %v3189_v27 = vld [vmem:[%s3386_s9 + $0x150] sm:$0xff]   ;;  %v3191_v29 = vld [vmem:[%s3386_s9 + $0x158] sm:$0xff]  }
  0x21   : > { %v3192_v30 = vld [vmem:[%s3386_s9 + $0x60] sm:$0xff]   ;;  %v3194_v32 = vld [vmem:[%s3386_s9 + $0x68] sm:$0xff]   ;;  %v3196_v34 = vld [vmem:[%s3386_s9 + $0x70] sm:$0xff]  }
  0x22   : > { %v3193_v31 = vld [vmem:[%s3386_s9 + $0x160] sm:$0xff]   ;;  %v3195_v33 = vld [vmem:[%s3386_s9 + $0x168] sm:$0xff]   ;;  %v3197_v35 = vld [vmem:[%s3386_s9 + $0x170] sm:$0xff]  }
  0x23   : > { %2997 = vmatmul.mubr.msk.bf16.gmra.mrb[4].mxu0 %vm660_vm2, %v3174_v12  ;;  %v3198_v36 = vld [vmem:[%s3386_s9 + $0x78] sm:$0xff]   ;;  %v3200_v38 = vld [vmem:[%s3386_s9 + $0x80] sm:$0xff]   ;;  %v3202_v40 = vld [vmem:[%s3386_s9 + $0x88] sm:$0xff]  }
  0x24   : > { %3061 = vmatmul.mubr.msk.bf16.gmra.mrb[4].mxu1 %vm660_vm2, %v3175_v13  ;;  %3000 = vmatprep.mubr.msk.bf16.mxu0 %vm660_vm2, %v3176_v14  ;;  %v3199_v37 = vld [vmem:[%s3386_s9 + $0x178] sm:$0xff]   ;;  %v3201_v39 = vld [vmem:[%s3386_s9 + $0x180] sm:$0xff]   ;;  %v3203_v41 = vld [vmem:[%s3386_s9 + $0x188] sm:$0xff]  }
  0x25   : > { %3064 = vmatprep.mubr.msk.bf16.mxu1 %vm660_vm2, %v3177_v15  ;;  %v3204_v42 = vld [vmem:[%s3386_s9 + $0x90] sm:$0xff]   ;;  %v3206_v44 = vld [vmem:[%s3386_s9 + $0x98] sm:$0xff]   ;;  %v3208_v46 = vld [vmem:[%s3386_s9 + $0xa0] sm:$0xff]  }
  0x26   : > { %v3205_v43 = vld [vmem:[%s3386_s9 + $0x190] sm:$0xff]   ;;  %v3207_v45 = vld [vmem:[%s3386_s9 + $0x198] sm:$0xff]   ;;  %v3209_v47 = vld [vmem:[%s3386_s9 + $0x1a0] sm:$0xff]  }
  0x27   : > { %v3210_v48 = vld [vmem:[%s3386_s9 + $0xa8] sm:$0xff]   ;;  %v3212_v50 = vld [vmem:[%s3386_s9 + $0xb0] sm:$0xff]   ;;  %v3214_v52 = vld [vmem:[%s3386_s9 + $0xb8] sm:$0xff]  }
  0x28   : > { %v3211_v49 = vld [vmem:[%s3386_s9 + $0x1a8] sm:$0xff]   ;;  %v3213_v51 = vld [vmem:[%s3386_s9 + $0x1b0] sm:$0xff]   ;;  %v3215_v53 = vld [vmem:[%s3386_s9 + $0x1b8] sm:$0xff]  }
  0x29   : > { %v3216_v54 = vld [vmem:[%s3386_s9 + $0xc0] sm:$0xff]   ;;  %v3218_v56 = vld [vmem:[%s3386_s9 + $0xc8] sm:$0xff]   ;;  %v3220_v58 = vld [vmem:[%s3386_s9 + $0xd0] sm:$0xff]  }
  0x2a   : > { %v3217_v55 = vld [vmem:[%s3386_s9 + $0x1c0] sm:$0xff]   ;;  %v3219_v57 = vld [vmem:[%s3386_s9 + $0x1c8] sm:$0xff]   ;;  %v3221_v59 = vld [vmem:[%s3386_s9 + $0x1d0] sm:$0xff]  }
  0x2b   : > { %3001 = vmatmul.mubr.msk.bf16.gmra.mrb[8].mxu0 %vm660_vm2, %v3178_v16  ;;  %v3222_v60 = vld [vmem:[%s3386_s9 + $0xd8] sm:$0xff]   ;;  %v3224_v62 = vld [vmem:[%s3386_s9 + $0xe0] sm:$0xff]   ;;  %v3226_v0 = vld [vmem:[%s3386_s9 + $0xe8] sm:$0xff]  }
  0x2c   : > { %3065 = vmatmul.mubr.msk.bf16.gmra.mrb[8].mxu1 %vm660_vm2, %v3179_v17  ;;  %3004 = vmatprep.mubr.msk.bf16.mxu0 %vm660_vm2, %v3180_v18  ;;  %v3223_v61 = vld [vmem:[%s3386_s9 + $0x1d8] sm:$0xff]   ;;  %v3225_v63 = vld [vmem:[%s3386_s9 + $0x1e0] sm:$0xff]   ;;  %v3227_v1 = vld [vmem:[%s3386_s9 + $0x1e8] sm:$0xff]  }
  0x2d   : > { %3068 = vmatprep.mubr.msk.bf16.mxu1 %vm660_vm2, %v3181_v19  ;;  %v3228_v2 = vld [vmem:[%s3386_s9 + $0xf0] sm:$0xff]   ;;  %v3230_v4 = vld [vmem:[%s3386_s9 + $0xf8] sm:$0xff]   ;;  %v3519_v6 = vld [vmem:[%s4107_s2] ss:$0 sm:$0xff] }
  0x2e   : > { %v3229_v3 = vld [vmem:[%s3386_s9 + $0x1f0] sm:$0xff]   ;;  %v3231_v5 = vld [vmem:[%s3386_s9 + $0x1f8] sm:$0xff]   ;;  %v3525_v8 = vld [vmem:[%s4108_s3] ss:$0 sm:$0xff]  ;;  %s3234_s9 = scalar_lea.vmem %s4050_s5, 8192 }
  0x2f   : > { %p3235_p11 = scmp.ne.s32.totalorder %s4050_s5, %s3234_s9  ;;  %p3242_p1 = scmp.lt.s32.totalorder %s3240_s13, %s3234_s9 }
  0x31   : > { %p3236_p12 = pnand %p3235_p11, %p3365_p5  ;;  %p3243_p2 = por %p3242_p1, %p3241_p0 }
  0x33   : > { %3005 = vmatmul.mubr.msk.bf16.gmra.mrb[12].mxu0 %vm660_vm2, %v3182_v20  ;;  %p3237_p13 = pneg %p3236_p12 }
  0x34   : > { %3069 = vmatmul.mubr.msk.bf16.gmra.mrb[12].mxu1 %vm660_vm2, %v3183_v21  ;;  %3008 = vmatprep.mubr.msk.bf16.mxu0 %vm660_vm2, %v3184_v22 }
  0x35   : > { %3072 = vmatprep.mubr.msk.bf16.mxu1 %vm660_vm2, %v3185_v23  ;;  %p3244_p3 = pnand %p3243_p2, %p3237_p13 }
  0x3b   : > { %3009 = vmatmul.mubr.msk.bf16.gmra.mrb[16].mxu0 %vm660_vm2, %v3186_v24 }
  0x3c   : > { %3073 = vmatmul.mubr.msk.bf16.gmra.mrb[16].mxu1 %vm660_vm2, %v3187_v25  ;;  %3012 = vmatprep.mubr.msk.bf16.mxu0 %vm660_vm2, %v3188_v26 }
  0x3d   : > { %3076 = vmatprep.mubr.msk.bf16.mxu1 %vm660_vm2, %v3189_v27 }
  0x43   : > { %3013 = vmatmul.mubr.msk.bf16.gmra.mrb[20].mxu0 %vm660_vm2, %v3190_v28 }
  0x44   : > { %3077 = vmatmul.mubr.msk.bf16.gmra.mrb[20].mxu1 %vm660_vm2, %v3191_v29  ;;  %3016 = vmatprep.mubr.msk.bf16.mxu0 %vm660_vm2, %v3192_v30 }
  0x45   : > { %3080 = vmatprep.mubr.msk.bf16.mxu1 %vm660_vm2, %v3193_v31 }
  0x4b   : > { %3017 = vmatmul.mubr.msk.bf16.gmra.mrb[24].mxu0 %vm660_vm2, %v3194_v32 }
  0x4c   : > { %3081 = vmatmul.mubr.msk.bf16.gmra.mrb[24].mxu1 %vm660_vm2, %v3195_v33  ;;  %3020 = vmatprep.mubr.msk.bf16.mxu0 %vm660_vm2, %v3196_v34 }
  0x4d   : > { %3084 = vmatprep.mubr.msk.bf16.mxu1 %vm660_vm2, %v3197_v35 }
  0x53   : > { %3021 = vmatmul.mubr.msk.bf16.gmra.mrb[28].mxu0 %vm660_vm2, %v3198_v36 }
  0x54   : > { %3085 = vmatmul.mubr.msk.bf16.gmra.mrb[28].mxu1 %vm660_vm2, %v3199_v37  ;;  %3024 = vmatprep.mubr.msk.bf16.mxu0 %vm660_vm2, %v3200_v38 }
  0x55   : > { %3088 = vmatprep.mubr.msk.bf16.mxu1 %vm660_vm2, %v3201_v39 }
  0x5b   : > { %3025 = vmatmul.mubr.msk.bf16.gmra.mrb[32].mxu0 %vm660_vm2, %v3202_v40 }
  0x5c   : > { %3089 = vmatmul.mubr.msk.bf16.gmra.mrb[32].mxu1 %vm660_vm2, %v3203_v41  ;;  %3028 = vmatprep.mubr.msk.bf16.mxu0 %vm660_vm2, %v3204_v42 }
  0x5d   : > { %3092 = vmatprep.mubr.msk.bf16.mxu1 %vm660_vm2, %v3205_v43 }
  0x63   : > { %3029 = vmatmul.mubr.msk.bf16.gmra.mrb[36].mxu0 %vm660_vm2, %v3206_v44 }
  0x64   : > { %3093 = vmatmul.mubr.msk.bf16.gmra.mrb[36].mxu1 %vm660_vm2, %v3207_v45  ;;  %3032 = vmatprep.mubr.msk.bf16.mxu0 %vm660_vm2, %v3208_v46 }
  0x65   : > { %3096 = vmatprep.mubr.msk.bf16.mxu1 %vm660_vm2, %v3209_v47 }
  0x6b   : > { %3033 = vmatmul.mubr.msk.bf16.gmra.mrb[40].mxu0 %vm660_vm2, %v3210_v48 }
  0x6c   : > { %3097 = vmatmul.mubr.msk.bf16.gmra.mrb[40].mxu1 %vm660_vm2, %v3211_v49  ;;  %3036 = vmatprep.mubr.msk.bf16.mxu0 %vm660_vm2, %v3212_v50 }
  0x6d   : > { %3100 = vmatprep.mubr.msk.bf16.mxu1 %vm660_vm2, %v3213_v51 }
  0x73   : > { %3037 = vmatmul.mubr.msk.bf16.gmra.mrb[44].mxu0 %vm660_vm2, %v3214_v52 }
  0x74   : > { %3101 = vmatmul.mubr.msk.bf16.gmra.mrb[44].mxu1 %vm660_vm2, %v3215_v53  ;;  %3040 = vmatprep.mubr.msk.bf16.mxu0 %vm660_vm2, %v3216_v54 }
  0x75   : > { %3104 = vmatprep.mubr.msk.bf16.mxu1 %vm660_vm2, %v3217_v55 }
  0x7b   : > { %3041 = vmatmul.mubr.msk.bf16.gmra.mrb[48].mxu0 %vm660_vm2, %v3218_v56 }
  0x7c   : > { %3105 = vmatmul.mubr.msk.bf16.gmra.mrb[48].mxu1 %vm660_vm2, %v3219_v57  ;;  %3044 = vmatprep.mubr.msk.bf16.mxu0 %vm660_vm2, %v3220_v58 }
  0x7d   : > { %3108 = vmatprep.mubr.msk.bf16.mxu1 %vm660_vm2, %v3221_v59 }
  0x83   : > { %3045 = vmatmul.mubr.msk.bf16.gmra.mrb[52].mxu0 %vm660_vm2, %v3222_v60 }
  0x84   : > { %3109 = vmatmul.mubr.msk.bf16.gmra.mrb[52].mxu1 %vm660_vm2, %v3223_v61  ;;  %3048 = vmatprep.mubr.msk.bf16.mxu0 %vm660_vm2, %v3224_v62 }
  0x85   : > { %3112 = vmatprep.mubr.msk.bf16.mxu1 %vm660_vm2, %v3225_v63 }
  0x8b   : > { %3049 = vmatmul.mubr.msk.bf16.gmra.mrb[56].mxu0 %vm660_vm2, %v3226_v0 }
  0x8c   : > { %3113 = vmatmul.mubr.msk.bf16.gmra.mrb[56].mxu1 %vm660_vm2, %v3227_v1  ;;  %3052 = vmatprep.mubr.msk.bf16.mxu0 %vm660_vm2, %v3228_v2 }
  0x8d   : > { %3116 = vmatprep.mubr.msk.bf16.mxu1 %vm660_vm2, %v3229_v3 }
  0x93   : > { %3053 = vmatmul.mubr.msk.bf16.gmra.mrb[60].mxu0 %vm660_vm2, %v3230_v4 }
  0x94   : > { %3117 = vmatmul.mubr.msk.bf16.gmra.mrb[60].mxu1 %vm660_vm2, %v3231_v5 }
  0xee   : > { %v2994_v7 = vpop.f32.mrb[0].mxu0 }
  0xef   : > { %v1414_v9 = vmul.f32 %v2994_v7, %v3519_v6  ;;  %v3058_v10 = vpop.f32.mrb[0].mxu1  ;;  %v894_v11 = vpop.f32.mrb[1].mxu0 }
  0xf0   : > { %v1478_v12 = vmul.f32 %v3058_v10, %v3519_v6  ;;  %v1412_v13 = vmul.f32 %v3519_v6, %v894_v11  ;;  %v1150_v14 = vpop.f32.mrb[1].mxu1  ;;  %v2995_v15 = vpop.f32.mrb[2].mxu0 }
  0xf1   : > { %v1549_v16 = vadd.f32 %v3525_v8, %v1414_v9  ;;  %v1476_v17 = vmul.f32 %v3519_v6, %v1150_v14  ;;  %v1415_v18 = vmul.f32 %v2995_v15, %v3519_v6  ;;  %v3059_v19 = vpop.f32.mrb[2].mxu1  ;;  %v897_v20 = vpop.f32.mrb[3].mxu0 }
  0xf2   : > { %v1613_v21 = vadd.f32 %v3525_v8, %v1478_v12  ;;  %v1547_v22 = vadd.f32 %v3525_v8, %v1412_v13  ;;  %v1479_v23 = vmul.f32 %v3059_v19, %v3519_v6  ;;  %v1413_v24 = vmul.f32 %v3519_v6, %v897_v20  ;;  %v1153_v25 = vpop.f32.mrb[3].mxu1 }
  0xf3   : > { %v1677_v26 = vmax.f32 %v1549_v16, 0.0  ;;  %v1611_v27 = vadd.f32 %v3525_v8, %v1476_v17  ;;  %v1550_v28 = vadd.f32 %v3525_v8, %v1415_v18  ;;  %v1477_v29 = vmul.f32 %v3519_v6, %v1153_v25 }
  0xf4   : > { %v1741_v30 = vmax.f32 %v1613_v21, 0.0  ;;  %v1675_v31 = vmax.f32 %v1547_v22, 0.0  ;;  %v1614_v32 = vadd.f32 %v3525_v8, %v1479_v23  ;;  %v1548_v33 = vadd.f32 %v3525_v8, %v1413_v24 }
  0xf5   : > { %v2795_v34 = vpack.c.bf16 %v1677_v26, %v1677_v26  ;;  %v1739_v35 = vmax.f32 %v1611_v27, 0.0  ;;  %v1678_v36 = vmax.f32 %v1550_v28, 0.0  ;;  %v1612_v37 = vadd.f32 %v3525_v8, %v1477_v29 }
  0xf6   : > { %v2859_v38 = vpack.c.bf16 %v1741_v30, %v1741_v30  ;;  %v2793_v39 = vpack.c.bf16 %v1675_v31, %v1675_v31  ;;  %v1742_v40 = vmax.f32 %v1614_v32, 0.0  ;;  %v1676_v41 = vmax.f32 %v1548_v33, 0.0  ;;  %v2998_v42 = vpop.f32.mrb[4].mxu0 }
  0xf7   : > { %2318 = vst.msk [vmem:[%s3545_s22 + $0x8] sm:$0xf] %vm2315_vm3, %v2795_v34  ;;  %v2857_v43 = vpack.c.bf16 %v1739_v35, %v1739_v35  ;;  %v2796_v44 = vpack.c.bf16 %v1678_v36, %v1678_v36  ;;  %v1740_v45 = vmax.f32 %v1612_v37, 0.0  ;;  %v1418_v46 = vmul.f32 %v2998_v42, %v3519_v6  ;;  %v3062_v47 = vpop.f32.mrb[4].mxu1  ;;  %v910_v48 = vpop.f32.mrb[5].mxu0 }
  0xf8   : > { %2382 = vst.msk [vmem:[%s3545_s22 + $0x108] sm:$0xf] %vm2315_vm3, %v2859_v38  ;;  %2316 = vst.msk [vmem:[%s3545_s22] sm:$0xf] %vm2315_vm3, %v2793_v39  ;;  %v2860_v49 = vpack.c.bf16 %v1742_v40, %v1742_v40  ;;  %v2794_v50 = vpack.c.bf16 %v1676_v41, %v1676_v41  ;;  %v1482_v51 = vmul.f32 %v3062_v47, %v3519_v6  ;;  %v1166_v53 = vpop.f32.mrb[5].mxu1  ;;  %v2999_v54 = vpop.f32.mrb[6].mxu0 }
  0xf9   : > { %v1416_v52 = vmul.f32 %v3519_v6, %v910_v48  ;;  %2380 = vst.msk [vmem:[%s3545_s22 + $0x100] sm:$0xf] %vm2315_vm3, %v2857_v43  ;;  %2319 = vst.msk [vmem:[%s3545_s22 + $0xc] sm:$0xf] %vm2315_vm3, %v2796_v44  ;;  %v2858_v55 = vpack.c.bf16 %v1740_v45, %v1740_v45  ;;  %v1553_v56 = vadd.f32 %v3525_v8, %v1418_v46  ;;  %v3063_v59 = vpop.f32.mrb[6].mxu1  ;;  %v913_v60 = vpop.f32.mrb[7].mxu0 }
  0xfa   : > { %v1480_v57 = vmul.f32 %v3519_v6, %v1166_v53  ;;  %v1419_v58 = vmul.f32 %v2999_v54, %v3519_v6  ;;  %2383 = vst.msk [vmem:[%s3545_s22 + $0x10c] sm:$0xf] %vm2315_vm3, %v2860_v49  ;;  %2317 = vst.msk [vmem:[%s3545_s22 + $0x4] sm:$0xf] %vm2315_vm3, %v2794_v50  ;;  %v1617_v61 = vadd.f32 %v3525_v8, %v1482_v51  ;;  %v1169_v1 = vpop.f32.mrb[7].mxu1 }
  0xfb   : > { %v1551_v62 = vadd.f32 %v3525_v8, %v1416_v52  ;;  %v1483_v63 = vmul.f32 %v3063_v59, %v3519_v6  ;;  %v1417_v0 = vmul.f32 %v3519_v6, %v913_v60  ;;  %2381 = vst.msk [vmem:[%s3545_s22 + $0x104] sm:$0xf] %vm2315_vm3, %v2858_v55  ;;  %v1681_v2 = vmax.f32 %v1553_v56, 0.0 }
  0xfc   : > { %v1615_v3 = vadd.f32 %v3525_v8, %v1480_v57  ;;  %v1554_v4 = vadd.f32 %v3525_v8, %v1419_v58  ;;  %v1481_v5 = vmul.f32 %v3519_v6, %v1169_v1  ;;  %v1745_v7 = vmax.f32 %v1617_v61, 0.0 }
  0xfd   : > { %v1679_v9 = vmax.f32 %v1551_v62, 0.0  ;;  %v1618_v10 = vadd.f32 %v3525_v8, %v1483_v63  ;;  %v1552_v11 = vadd.f32 %v3525_v8, %v1417_v0  ;;  %v2799_v12 = vpack.c.bf16 %v1681_v2, %v1681_v2 }
  0xfe   : > { %v1743_v13 = vmax.f32 %v1615_v3, 0.0  ;;  %v1682_v14 = vmax.f32 %v1554_v4, 0.0  ;;  %v1616_v15 = vadd.f32 %v3525_v8, %v1481_v5  ;;  %v2863_v16 = vpack.c.bf16 %v1745_v7, %v1745_v7  ;;  %v3002_v20 = vpop.f32.mrb[8].mxu0 }
  0xff   : > { %v2797_v17 = vpack.c.bf16 %v1679_v9, %v1679_v9  ;;  %v1746_v18 = vmax.f32 %v1618_v10, 0.0  ;;  %v1680_v19 = vmax.f32 %v1552_v11, 0.0  ;;  %2322 = vst.msk [vmem:[%s3545_s22 + $0x18] sm:$0xf] %vm2315_vm3, %v2799_v12  ;;  %v1422_v24 = vmul.f32 %v3002_v20, %v3519_v6  ;;  %v3066_v25 = vpop.f32.mrb[8].mxu1  ;;  %v926_v26 = vpop.f32.mrb[9].mxu0 }
 0x100   : > { %v2861_v21 = vpack.c.bf16 %v1743_v13, %v1743_v13  ;;  %v2800_v22 = vpack.c.bf16 %v1682_v14, %v1682_v14  ;;  %v1744_v23 = vmax.f32 %v1616_v15, 0.0  ;;  %2386 = vst.msk [vmem:[%s3545_s22 + $0x118] sm:$0xf] %vm2315_vm3, %v2863_v16  ;;  %v1486_v29 = vmul.f32 %v3066_v25, %v3519_v6  ;;  %v1182_v31 = vpop.f32.mrb[9].mxu1  ;;  %v3003_v32 = vpop.f32.mrb[10].mxu0 }
 0x101   : > { %2320 = vst.msk [vmem:[%s3545_s22 + $0x10] sm:$0xf] %vm2315_vm3, %v2797_v17  ;;  %v2864_v27 = vpack.c.bf16 %v1746_v18, %v1746_v18  ;;  %v2798_v28 = vpack.c.bf16 %v1680_v19, %v1680_v19  ;;  %v1420_v30 = vmul.f32 %v3519_v6, %v926_v26  ;;  %v1557_v34 = vadd.f32 %v3525_v8, %v1422_v24  ;;  %v3067_v37 = vpop.f32.mrb[10].mxu1  ;;  %v929_v38 = vpop.f32.mrb[11].mxu0 }
 0x102   : > { %2384 = vst.msk [vmem:[%s3545_s22 + $0x110] sm:$0xf] %vm2315_vm3, %v2861_v21  ;;  %2323 = vst.msk [vmem:[%s3545_s22 + $0x1c] sm:$0xf] %vm2315_vm3, %v2800_v22  ;;  %v2862_v33 = vpack.c.bf16 %v1744_v23, %v1744_v23  ;;  %v1484_v35 = vmul.f32 %v3519_v6, %v1182_v31  ;;  %v1423_v36 = vmul.f32 %v3003_v32, %v3519_v6  ;;  %v1185_v43 = vpop.f32.mrb[11].mxu1 }
 0x103   : > { %2387 = vst.msk [vmem:[%s3545_s22 + $0x11c] sm:$0xf] %vm2315_vm3, %v2864_v27  ;;  %2321 = vst.msk [vmem:[%s3545_s22 + $0x14] sm:$0xf] %vm2315_vm3, %v2798_v28  ;;  %v1621_v39 = vadd.f32 %v3525_v8, %v1486_v29  ;;  %v1555_v40 = vadd.f32 %v3525_v8, %v1420_v30  ;;  %v1487_v41 = vmul.f32 %v3067_v37, %v3519_v6  ;;  %v1685_v44 = vmax.f32 %v1557_v34, 0.0 }
 0x104   : > { %v1421_v42 = vmul.f32 %v3519_v6, %v929_v38  ;;  %2385 = vst.msk [vmem:[%s3545_s22 + $0x114] sm:$0xf] %vm2315_vm3, %v2862_v33  ;;  %v1619_v45 = vadd.f32 %v3525_v8, %v1484_v35  ;;  %v1558_v46 = vadd.f32 %v3525_v8, %v1423_v36  ;;  %v1485_v47 = vmul.f32 %v3519_v6, %v1185_v43 }
 0x105   : > { %v1749_v48 = vmax.f32 %v1621_v39, 0.0  ;;  %v1683_v49 = vmax.f32 %v1555_v40, 0.0  ;;  %v1622_v50 = vadd.f32 %v3525_v8, %v1487_v41  ;;  %v2803_v52 = vpack.c.bf16 %v1685_v44, %v1685_v44 }
 0x106   : > { %v1556_v51 = vadd.f32 %v3525_v8, %v1421_v42  ;;  %v1747_v53 = vmax.f32 %v1619_v45, 0.0  ;;  %v1686_v54 = vmax.f32 %v1558_v46, 0.0  ;;  %v1620_v55 = vadd.f32 %v3525_v8, %v1485_v47  ;;  %v3006_v60 = vpop.f32.mrb[12].mxu0 }
 0x107   : > { %v2867_v56 = vpack.c.bf16 %v1749_v48, %v1749_v48  ;;  %v2801_v57 = vpack.c.bf16 %v1683_v49, %v1683_v49  ;;  %v1750_v58 = vmax.f32 %v1622_v50, 0.0  ;;  %2326 = vst.msk [vmem:[%s3545_s22 + $0x28] sm:$0xf] %vm2315_vm3, %v2803_v52  ;;  %v1426_v0 = vmul.f32 %v3006_v60, %v3519_v6  ;;  %v3070_v1 = vpop.f32.mrb[12].mxu1  ;;  %v942_v2 = vpop.f32.mrb[13].mxu0 }
 0x108   : > { %v1684_v59 = vmax.f32 %v1556_v51, 0.0  ;;  %v2865_v61 = vpack.c.bf16 %v1747_v53, %v1747_v53  ;;  %v2804_v62 = vpack.c.bf16 %v1686_v54, %v1686_v54  ;;  %v1748_v63 = vmax.f32 %v1620_v55, 0.0  ;;  %v1198_v9 = vpop.f32.mrb[13].mxu1  ;;  %v3007_v10 = vpop.f32.mrb[14].mxu0 }
 0x109   : > { %2390 = vst.msk [vmem:[%s3545_s22 + $0x128] sm:$0xf] %vm2315_vm3, %v2867_v56  ;;  %2324 = vst.msk [vmem:[%s3545_s22 + $0x20] sm:$0xf] %vm2315_vm3, %v2801_v57  ;;  %v2868_v3 = vpack.c.bf16 %v1750_v58, %v1750_v58  ;;  %v1490_v5 = vmul.f32 %v3070_v1, %v3519_v6  ;;  %v1424_v7 = vmul.f32 %v3519_v6, %v942_v2  ;;  %v3071_v15 = vpop.f32.mrb[14].mxu1  ;;  %v945_v16 = vpop.f32.mrb[15].mxu0 }
 0x10a   : > { %v2802_v4 = vpack.c.bf16 %v1684_v59, %v1684_v59  ;;  %2388 = vst.msk [vmem:[%s3545_s22 + $0x120] sm:$0xf] %vm2315_vm3, %v2865_v61  ;;  %2327 = vst.msk [vmem:[%s3545_s22 + $0x2c] sm:$0xf] %vm2315_vm3, %v2804_v62  ;;  %v2866_v11 = vpack.c.bf16 %v1748_v63, %v1748_v63  ;;  %v1561_v12 = vadd.f32 %v3525_v8, %v1426_v0  ;;  %v1201_v21 = vpop.f32.mrb[15].mxu1 }
 0x10b   : > { %v1488_v13 = vmul.f32 %v3519_v6, %v1198_v9  ;;  %v1427_v14 = vmul.f32 %v3007_v10, %v3519_v6  ;;  %2391 = vst.msk [vmem:[%s3545_s22 + $0x12c] sm:$0xf] %vm2315_vm3, %v2868_v3  ;;  %v1625_v17 = vadd.f32 %v3525_v8, %v1490_v5  ;;  %v1559_v18 = vadd.f32 %v3525_v8, %v1424_v7 }
 0x10c   : > { %2325 = vst.msk [vmem:[%s3545_s22 + $0x24] sm:$0xf] %vm2315_vm3, %v2802_v4  ;;  %v1491_v19 = vmul.f32 %v3071_v15, %v3519_v6  ;;  %v1425_v20 = vmul.f32 %v3519_v6, %v945_v16  ;;  %2389 = vst.msk [vmem:[%s3545_s22 + $0x124] sm:$0xf] %vm2315_vm3, %v2866_v11  ;;  %v1689_v22 = vmax.f32 %v1561_v12, 0.0  ;;  %v1489_v25 = vmul.f32 %v3519_v6, %v1201_v21 }
 0x10d   : > { %v1623_v23 = vadd.f32 %v3525_v8, %v1488_v13  ;;  %v1562_v24 = vadd.f32 %v3525_v8, %v1427_v14  ;;  %v1753_v26 = vmax.f32 %v1625_v17, 0.0  ;;  %v1687_v27 = vmax.f32 %v1559_v18, 0.0 }
 0x10e   : > { %v1626_v28 = vadd.f32 %v3525_v8, %v1491_v19  ;;  %v1560_v29 = vadd.f32 %v3525_v8, %v1425_v20  ;;  %v2807_v30 = vpack.c.bf16 %v1689_v22, %v1689_v22  ;;  %v1624_v33 = vadd.f32 %v3525_v8, %v1489_v25  ;;  %v3010_v38 = vpop.f32.mrb[16].mxu0 }
 0x10f   : > { %v1751_v31 = vmax.f32 %v1623_v23, 0.0  ;;  %v1690_v32 = vmax.f32 %v1562_v24, 0.0  ;;  %v2871_v34 = vpack.c.bf16 %v1753_v26, %v1753_v26  ;;  %v2805_v35 = vpack.c.bf16 %v1687_v27, %v1687_v27  ;;  %v3074_v43 = vpop.f32.mrb[16].mxu1  ;;  %v958_v44 = vpop.f32.mrb[17].mxu0 }
 0x110   : > { %v1754_v36 = vmax.f32 %v1626_v28, 0.0  ;;  %v1688_v37 = vmax.f32 %v1560_v29, 0.0  ;;  %2330 = vst.msk [vmem:[%s3545_s22 + $0x38] sm:$0xf] %vm2315_vm3, %v2807_v30  ;;  %v1752_v41 = vmax.f32 %v1624_v33, 0.0  ;;  %v1430_v42 = vmul.f32 %v3010_v38, %v3519_v6  ;;  %v1214_v49 = vpop.f32.mrb[17].mxu1 }
 0x111   : > { %v2869_v39 = vpack.c.bf16 %v1751_v31, %v1751_v31  ;;  %v2808_v40 = vpack.c.bf16 %v1690_v32, %v1690_v32  ;;  %2394 = vst.msk [vmem:[%s3545_s22 + $0x138] sm:$0xf] %vm2315_vm3, %v2871_v34  ;;  %2328 = vst.msk [vmem:[%s3545_s22 + $0x30] sm:$0xf] %vm2315_vm3, %v2805_v35  ;;  %v1494_v47 = vmul.f32 %v3074_v43, %v3519_v6  ;;  %v3011_v50 = vpop.f32.mrb[18].mxu0  ;;  %v3075_v55 = vpop.f32.mrb[18].mxu1 }
 0x112   : > { %v2872_v45 = vpack.c.bf16 %v1754_v36, %v1754_v36  ;;  %v2806_v46 = vpack.c.bf16 %v1688_v37, %v1688_v37  ;;  %v1428_v48 = vmul.f32 %v3519_v6, %v958_v44  ;;  %v2870_v51 = vpack.c.bf16 %v1752_v41, %v1752_v41  ;;  %v961_v56 = vpop.f32.mrb[19].mxu0  ;;  %v1217_v61 = vpop.f32.mrb[19].mxu1 }
 0x113   : > { %2392 = vst.msk [vmem:[%s3545_s22 + $0x130] sm:$0xf] %vm2315_vm3, %v2869_v39  ;;  %2331 = vst.msk [vmem:[%s3545_s22 + $0x3c] sm:$0xf] %vm2315_vm3, %v2808_v40  ;;  %v1565_v52 = vadd.f32 %v3525_v8, %v1430_v42  ;;  %v1492_v53 = vmul.f32 %v3519_v6, %v1214_v49  ;;  %v1431_v54 = vmul.f32 %v3011_v50, %v3519_v6 }
 0x114   : > { %2395 = vst.msk [vmem:[%s3545_s22 + $0x13c] sm:$0xf] %vm2315_vm3, %v2872_v45  ;;  %2329 = vst.msk [vmem:[%s3545_s22 + $0x34] sm:$0xf] %vm2315_vm3, %v2806_v46  ;;  %v1629_v57 = vadd.f32 %v3525_v8, %v1494_v47  ;;  %v1563_v58 = vadd.f32 %v3525_v8, %v1428_v48  ;;  %v1495_v59 = vmul.f32 %v3075_v55, %v3519_v6 }
 0x115   : > { %v1429_v60 = vmul.f32 %v3519_v6, %v961_v56  ;;  %2393 = vst.msk [vmem:[%s3545_s22 + $0x134] sm:$0xf] %vm2315_vm3, %v2870_v51  ;;  %v1693_v62 = vmax.f32 %v1565_v52, 0.0  ;;  %v1627_v63 = vadd.f32 %v3525_v8, %v1492_v53  ;;  %v1566_v0 = vadd.f32 %v3525_v8, %v1431_v54 }
 0x116   : > { %v1493_v1 = vmul.f32 %v3519_v6, %v1217_v61  ;;  %v1757_v2 = vmax.f32 %v1629_v57, 0.0  ;;  %v1691_v3 = vmax.f32 %v1563_v58, 0.0  ;;  %v1630_v4 = vadd.f32 %v3525_v8, %v1495_v59  ;;  %v3014_v16 = vpop.f32.mrb[20].mxu0 }
 0x117   : > { %v1564_v5 = vadd.f32 %v3525_v8, %v1429_v60  ;;  %v2811_v7 = vpack.c.bf16 %v1693_v62, %v1693_v62  ;;  %v1755_v9 = vmax.f32 %v1627_v63, 0.0  ;;  %v1694_v10 = vmax.f32 %v1566_v0, 0.0  ;;  %v3078_v21 = vpop.f32.mrb[20].mxu1  ;;  %v974_v22 = vpop.f32.mrb[21].mxu0 }
 0x118   : > { %v1628_v11 = vadd.f32 %v3525_v8, %v1493_v1  ;;  %v2875_v12 = vpack.c.bf16 %v1757_v2, %v1757_v2  ;;  %v2809_v13 = vpack.c.bf16 %v1691_v3, %v1691_v3  ;;  %v1758_v14 = vmax.f32 %v1630_v4, 0.0  ;;  %v1230_v27 = vpop.f32.mrb[21].mxu1  ;;  %v3015_v28 = vpop.f32.mrb[22].mxu0 }
 0x119   : > { %v1692_v15 = vmax.f32 %v1564_v5, 0.0  ;;  %2334 = vst.msk [vmem:[%s3545_s22 + $0x48] sm:$0xf] %vm2315_vm3, %v2811_v7  ;;  %v2873_v17 = vpack.c.bf16 %v1755_v9, %v1755_v9  ;;  %v2812_v18 = vpack.c.bf16 %v1694_v10, %v1694_v10  ;;  %v1434_v20 = vmul.f32 %v3014_v16, %v3519_v6  ;;  %v3079_v33 = vpop.f32.mrb[22].mxu1  ;;  %v977_v34 = vpop.f32.mrb[23].mxu0 }
 0x11a   : > { %v1756_v19 = vmax.f32 %v1628_v11, 0.0  ;;  %2398 = vst.msk [vmem:[%s3545_s22 + $0x148] sm:$0xf] %vm2315_vm3, %v2875_v12  ;;  %2332 = vst.msk [vmem:[%s3545_s22 + $0x40] sm:$0xf] %vm2315_vm3, %v2809_v13  ;;  %v2876_v23 = vpack.c.bf16 %v1758_v14, %v1758_v14  ;;  %v1498_v25 = vmul.f32 %v3078_v21, %v3519_v6  ;;  %v1432_v26 = vmul.f32 %v3519_v6, %v974_v22  ;;  %v1233_v39 = vpop.f32.mrb[23].mxu1 }
 0x11b   : > { %v2810_v24 = vpack.c.bf16 %v1692_v15, %v1692_v15  ;;  %2396 = vst.msk [vmem:[%s3545_s22 + $0x140] sm:$0xf] %vm2315_vm3, %v2873_v17  ;;  %2335 = vst.msk [vmem:[%s3545_s22 + $0x4c] sm:$0xf] %vm2315_vm3, %v2812_v18  ;;  %v1569_v30 = vadd.f32 %v3525_v8, %v1434_v20  ;;  %v1496_v31 = vmul.f32 %v3519_v6, %v1230_v27 }
 0x11c   : > { %v2874_v29 = vpack.c.bf16 %v1756_v19, %v1756_v19  ;;  %v1435_v32 = vmul.f32 %v3015_v28, %v3519_v6  ;;  %2399 = vst.msk [vmem:[%s3545_s22 + $0x14c] sm:$0xf] %vm2315_vm3, %v2876_v23  ;;  %v1633_v35 = vadd.f32 %v3525_v8, %v1498_v25  ;;  %v1567_v36 = vadd.f32 %v3525_v8, %v1432_v26 }
 0x11d   : > { %2333 = vst.msk [vmem:[%s3545_s22 + $0x44] sm:$0xf] %vm2315_vm3, %v2810_v24  ;;  %v1499_v37 = vmul.f32 %v3079_v33, %v3519_v6  ;;  %v1433_v38 = vmul.f32 %v3519_v6, %v977_v34  ;;  %v1697_v40 = vmax.f32 %v1569_v30, 0.0  ;;  %v1631_v41 = vadd.f32 %v3525_v8, %v1496_v31 }
 0x11e   : > { %2397 = vst.msk [vmem:[%s3545_s22 + $0x144] sm:$0xf] %vm2315_vm3, %v2874_v29  ;;  %v1570_v42 = vadd.f32 %v3525_v8, %v1435_v32  ;;  %v1497_v43 = vmul.f32 %v3519_v6, %v1233_v39  ;;  %v1761_v44 = vmax.f32 %v1633_v35, 0.0  ;;  %v1695_v45 = vmax.f32 %v1567_v36, 0.0  ;;  %v3018_v56 = vpop.f32.mrb[24].mxu0 }
 0x11f   : > { %v1634_v46 = vadd.f32 %v3525_v8, %v1499_v37  ;;  %v1568_v47 = vadd.f32 %v3525_v8, %v1433_v38  ;;  %v2815_v48 = vpack.c.bf16 %v1697_v40, %v1697_v40  ;;  %v1759_v49 = vmax.f32 %v1631_v41, 0.0  ;;  %v3082_v61 = vpop.f32.mrb[24].mxu1  ;;  %v990_v62 = vpop.f32.mrb[25].mxu0 }
 0x120   : > { %v1698_v50 = vmax.f32 %v1570_v42, 0.0  ;;  %v1632_v51 = vadd.f32 %v3525_v8, %v1497_v43  ;;  %v2879_v52 = vpack.c.bf16 %v1761_v44, %v1761_v44  ;;  %v2813_v53 = vpack.c.bf16 %v1695_v45, %v1695_v45  ;;  %v1246_v3 = vpop.f32.mrb[25].mxu1  ;;  %v3019_v4 = vpop.f32.mrb[26].mxu0 }
 0x121   : > { %v1762_v54 = vmax.f32 %v1634_v46, 0.0  ;;  %v1696_v55 = vmax.f32 %v1568_v47, 0.0  ;;  %2338 = vst.msk [vmem:[%s3545_s22 + $0x58] sm:$0xf] %vm2315_vm3, %v2815_v48  ;;  %v2877_v57 = vpack.c.bf16 %v1759_v49, %v1759_v49  ;;  %v1438_v60 = vmul.f32 %v3018_v56, %v3519_v6  ;;  %v3083_v11 = vpop.f32.mrb[26].mxu1  ;;  %v993_v12 = vpop.f32.mrb[27].mxu0 }
 0x122   : > { %v2816_v58 = vpack.c.bf16 %v1698_v50, %v1698_v50  ;;  %v1760_v59 = vmax.f32 %v1632_v51, 0.0  ;;  %2402 = vst.msk [vmem:[%s3545_s22 + $0x158] sm:$0xf] %vm2315_vm3, %v2879_v52  ;;  %2336 = vst.msk [vmem:[%s3545_s22 + $0x50] sm:$0xf] %vm2315_vm3, %v2813_v53  ;;  %v1502_v1 = vmul.f32 %v3082_v61, %v3519_v6  ;;  %v1436_v2 = vmul.f32 %v3519_v6, %v990_v62  ;;  %v1249_v17 = vpop.f32.mrb[27].mxu1 }
 0x123   : > { %v2880_v63 = vpack.c.bf16 %v1762_v54, %v1762_v54  ;;  %v2814_v0 = vpack.c.bf16 %v1696_v55, %v1696_v55  ;;  %2400 = vst.msk [vmem:[%s3545_s22 + $0x150] sm:$0xf] %vm2315_vm3, %v2877_v57  ;;  %v1573_v7 = vadd.f32 %v3525_v8, %v1438_v60  ;;  %v1500_v9 = vmul.f32 %v3519_v6, %v1246_v3 }
 0x124   : > { %2339 = vst.msk [vmem:[%s3545_s22 + $0x5c] sm:$0xf] %vm2315_vm3, %v2816_v58  ;;  %v2878_v5 = vpack.c.bf16 %v1760_v59, %v1760_v59  ;;  %v1439_v10 = vmul.f32 %v3019_v4, %v3519_v6  ;;  %v1637_v13 = vadd.f32 %v3525_v8, %v1502_v1  ;;  %v1571_v14 = vadd.f32 %v3525_v8, %v1436_v2 }
 0x125   : > { %2403 = vst.msk [vmem:[%s3545_s22 + $0x15c] sm:$0xf] %vm2315_vm3, %v2880_v63  ;;  %2337 = vst.msk [vmem:[%s3545_s22 + $0x54] sm:$0xf] %vm2315_vm3, %v2814_v0  ;;  %v1503_v15 = vmul.f32 %v3083_v11, %v3519_v6  ;;  %v1437_v16 = vmul.f32 %v3519_v6, %v993_v12  ;;  %v1701_v18 = vmax.f32 %v1573_v7, 0.0  ;;  %v1635_v19 = vadd.f32 %v3525_v8, %v1500_v9 }
 0x126   : > { %2401 = vst.msk [vmem:[%s3545_s22 + $0x154] sm:$0xf] %vm2315_vm3, %v2878_v5  ;;  %v1574_v20 = vadd.f32 %v3525_v8, %v1439_v10  ;;  %v1501_v21 = vmul.f32 %v3519_v6, %v1249_v17  ;;  %v1765_v22 = vmax.f32 %v1637_v13, 0.0  ;;  %v1699_v23 = vmax.f32 %v1571_v14, 0.0  ;;  %v3022_v34 = vpop.f32.mrb[28].mxu0 }
 0x127   : > { %v1638_v24 = vadd.f32 %v3525_v8, %v1503_v15  ;;  %v1572_v25 = vadd.f32 %v3525_v8, %v1437_v16  ;;  %v2819_v26 = vpack.c.bf16 %v1701_v18, %v1701_v18  ;;  %v1763_v27 = vmax.f32 %v1635_v19, 0.0  ;;  %v3086_v39 = vpop.f32.mrb[28].mxu1  ;;  %v1006_v40 = vpop.f32.mrb[29].mxu0 }
 0x128   : > { %v1702_v28 = vmax.f32 %v1574_v20, 0.0  ;;  %v1636_v29 = vadd.f32 %v3525_v8, %v1501_v21  ;;  %v2883_v30 = vpack.c.bf16 %v1765_v22, %v1765_v22  ;;  %v2817_v31 = vpack.c.bf16 %v1699_v23, %v1699_v23  ;;  %v1262_v45 = vpop.f32.mrb[29].mxu1  ;;  %v3023_v46 = vpop.f32.mrb[30].mxu0 }
 0x129   : > { %v1766_v32 = vmax.f32 %v1638_v24, 0.0  ;;  %v1700_v33 = vmax.f32 %v1572_v25, 0.0  ;;  %2342 = vst.msk [vmem:[%s3545_s22 + $0x68] sm:$0xf] %vm2315_vm3, %v2819_v26  ;;  %v2881_v35 = vpack.c.bf16 %v1763_v27, %v1763_v27  ;;  %v1442_v38 = vmul.f32 %v3022_v34, %v3519_v6  ;;  %v3087_v51 = vpop.f32.mrb[30].mxu1  ;;  %v1009_v52 = vpop.f32.mrb[31].mxu0 }
 0x12a   : > { %v2820_v36 = vpack.c.bf16 %v1702_v28, %v1702_v28  ;;  %v1764_v37 = vmax.f32 %v1636_v29, 0.0  ;;  %2406 = vst.msk [vmem:[%s3545_s22 + $0x168] sm:$0xf] %vm2315_vm3, %v2883_v30  ;;  %2340 = vst.msk [vmem:[%s3545_s22 + $0x60] sm:$0xf] %vm2315_vm3, %v2817_v31  ;;  %v1506_v43 = vmul.f32 %v3086_v39, %v3519_v6  ;;  %v1440_v44 = vmul.f32 %v3519_v6, %v1006_v40  ;;  %v1265_v57 = vpop.f32.mrb[31].mxu1 }
 0x12b   : > { %v2884_v41 = vpack.c.bf16 %v1766_v32, %v1766_v32  ;;  %v2818_v42 = vpack.c.bf16 %v1700_v33, %v1700_v33  ;;  %2404 = vst.msk [vmem:[%s3545_s22 + $0x160] sm:$0xf] %vm2315_vm3, %v2881_v35  ;;  %v1577_v48 = vadd.f32 %v3525_v8, %v1442_v38  ;;  %v1504_v49 = vmul.f32 %v3519_v6, %v1262_v45 }
 0x12c   : > { %2343 = vst.msk [vmem:[%s3545_s22 + $0x6c] sm:$0xf] %vm2315_vm3, %v2820_v36  ;;  %v2882_v47 = vpack.c.bf16 %v1764_v37, %v1764_v37  ;;  %v1443_v50 = vmul.f32 %v3023_v46, %v3519_v6  ;;  %v1641_v53 = vadd.f32 %v3525_v8, %v1506_v43  ;;  %v1575_v54 = vadd.f32 %v3525_v8, %v1440_v44 }
 0x12d   : > { %2407 = vst.msk [vmem:[%s3545_s22 + $0x16c] sm:$0xf] %vm2315_vm3, %v2884_v41  ;;  %2341 = vst.msk [vmem:[%s3545_s22 + $0x64] sm:$0xf] %vm2315_vm3, %v2818_v42  ;;  %v1507_v55 = vmul.f32 %v3087_v51, %v3519_v6  ;;  %v1441_v56 = vmul.f32 %v3519_v6, %v1009_v52  ;;  %v1705_v58 = vmax.f32 %v1577_v48, 0.0  ;;  %v1639_v59 = vadd.f32 %v3525_v8, %v1504_v49 }
 0x12e   : > { %2405 = vst.msk [vmem:[%s3545_s22 + $0x164] sm:$0xf] %vm2315_vm3, %v2882_v47  ;;  %v1578_v60 = vadd.f32 %v3525_v8, %v1443_v50  ;;  %v1505_v61 = vmul.f32 %v3519_v6, %v1265_v57  ;;  %v1769_v62 = vmax.f32 %v1641_v53, 0.0  ;;  %v1703_v63 = vmax.f32 %v1575_v54, 0.0  ;;  %v3026_v12 = vpop.f32.mrb[32].mxu0 }
 0x12f   : > { %v1642_v0 = vadd.f32 %v3525_v8, %v1507_v55  ;;  %v1576_v1 = vadd.f32 %v3525_v8, %v1441_v56  ;;  %v2823_v2 = vpack.c.bf16 %v1705_v58, %v1705_v58  ;;  %v1767_v3 = vmax.f32 %v1639_v59, 0.0  ;;  %v3090_v17 = vpop.f32.mrb[32].mxu1  ;;  %v1022_v18 = vpop.f32.mrb[33].mxu0 }
 0x130   : > { %v1706_v4 = vmax.f32 %v1578_v60, 0.0  ;;  %v1640_v5 = vadd.f32 %v3525_v8, %v1505_v61  ;;  %v2887_v7 = vpack.c.bf16 %v1769_v62, %v1769_v62  ;;  %v2821_v9 = vpack.c.bf16 %v1703_v63, %v1703_v63  ;;  %v1278_v23 = vpop.f32.mrb[33].mxu1  ;;  %v3027_v24 = vpop.f32.mrb[34].mxu0 }
 0x131   : > { %v1770_v10 = vmax.f32 %v1642_v0, 0.0  ;;  %v1704_v11 = vmax.f32 %v1576_v1, 0.0  ;;  %2346 = vst.msk [vmem:[%s3545_s22 + $0x78] sm:$0xf] %vm2315_vm3, %v2823_v2  ;;  %v2885_v13 = vpack.c.bf16 %v1767_v3, %v1767_v3  ;;  %v1446_v16 = vmul.f32 %v3026_v12, %v3519_v6  ;;  %v3091_v29 = vpop.f32.mrb[34].mxu1  ;;  %v1025_v30 = vpop.f32.mrb[35].mxu0 }
 0x132   : > { %v2824_v14 = vpack.c.bf16 %v1706_v4, %v1706_v4  ;;  %v1768_v15 = vmax.f32 %v1640_v5, 0.0  ;;  %2410 = vst.msk [vmem:[%s3545_s22 + $0x178] sm:$0xf] %vm2315_vm3, %v2887_v7  ;;  %2344 = vst.msk [vmem:[%s3545_s22 + $0x70] sm:$0xf] %vm2315_vm3, %v2821_v9  ;;  %v1510_v21 = vmul.f32 %v3090_v17, %v3519_v6  ;;  %v1444_v22 = vmul.f32 %v3519_v6, %v1022_v18  ;;  %v1281_v35 = vpop.f32.mrb[35].mxu1 }
 0x133   : > { %v2888_v19 = vpack.c.bf16 %v1770_v10, %v1770_v10  ;;  %v2822_v20 = vpack.c.bf16 %v1704_v11, %v1704_v11  ;;  %2408 = vst.msk [vmem:[%s3545_s22 + $0x170] sm:$0xf] %vm2315_vm3, %v2885_v13  ;;  %v1581_v26 = vadd.f32 %v3525_v8, %v1446_v16  ;;  %v1508_v27 = vmul.f32 %v3519_v6, %v1278_v23 }
 0x134   : > { %2347 = vst.msk [vmem:[%s3545_s22 + $0x7c] sm:$0xf] %vm2315_vm3, %v2824_v14  ;;  %v2886_v25 = vpack.c.bf16 %v1768_v15, %v1768_v15  ;;  %v1447_v28 = vmul.f32 %v3027_v24, %v3519_v6  ;;  %v1645_v31 = vadd.f32 %v3525_v8, %v1510_v21  ;;  %v1579_v32 = vadd.f32 %v3525_v8, %v1444_v22 }
 0x135   : > { %2411 = vst.msk [vmem:[%s3545_s22 + $0x17c] sm:$0xf] %vm2315_vm3, %v2888_v19  ;;  %2345 = vst.msk [vmem:[%s3545_s22 + $0x74] sm:$0xf] %vm2315_vm3, %v2822_v20  ;;  %v1511_v33 = vmul.f32 %v3091_v29, %v3519_v6  ;;  %v1445_v34 = vmul.f32 %v3519_v6, %v1025_v30  ;;  %v1709_v36 = vmax.f32 %v1581_v26, 0.0  ;;  %v1643_v37 = vadd.f32 %v3525_v8, %v1508_v27 }
 0x136   : > { %2409 = vst.msk [vmem:[%s3545_s22 + $0x174] sm:$0xf] %vm2315_vm3, %v2886_v25  ;;  %v1582_v38 = vadd.f32 %v3525_v8, %v1447_v28  ;;  %v1509_v39 = vmul.f32 %v3519_v6, %v1281_v35  ;;  %v1773_v40 = vmax.f32 %v1645_v31, 0.0  ;;  %v1707_v41 = vmax.f32 %v1579_v32, 0.0  ;;  %v3030_v52 = vpop.f32.mrb[36].mxu0 }
 0x137   : > { %v1646_v42 = vadd.f32 %v3525_v8, %v1511_v33  ;;  %v1580_v43 = vadd.f32 %v3525_v8, %v1445_v34  ;;  %v2827_v44 = vpack.c.bf16 %v1709_v36, %v1709_v36  ;;  %v1771_v45 = vmax.f32 %v1643_v37, 0.0  ;;  %v3094_v57 = vpop.f32.mrb[36].mxu1  ;;  %v1038_v58 = vpop.f32.mrb[37].mxu0 }
 0x138   : > { %v1710_v46 = vmax.f32 %v1582_v38, 0.0  ;;  %v1644_v47 = vadd.f32 %v3525_v8, %v1509_v39  ;;  %v2891_v48 = vpack.c.bf16 %v1773_v40, %v1773_v40  ;;  %v2825_v49 = vpack.c.bf16 %v1707_v41, %v1707_v41  ;;  %v1294_v63 = vpop.f32.mrb[37].mxu1  ;;  %v3031_v0 = vpop.f32.mrb[38].mxu0 }
 0x139   : > { %v1774_v50 = vmax.f32 %v1646_v42, 0.0  ;;  %v1708_v51 = vmax.f32 %v1580_v43, 0.0  ;;  %2350 = vst.msk [vmem:[%s3545_s22 + $0x88] sm:$0xf] %vm2315_vm3, %v2827_v44  ;;  %v2889_v53 = vpack.c.bf16 %v1771_v45, %v1771_v45  ;;  %v1450_v56 = vmul.f32 %v3030_v52, %v3519_v6  ;;  %v3095_v5 = vpop.f32.mrb[38].mxu1  ;;  %v1041_v7 = vpop.f32.mrb[39].mxu0 }
 0x13a   : > { %v2828_v54 = vpack.c.bf16 %v1710_v46, %v1710_v46  ;;  %v1772_v55 = vmax.f32 %v1644_v47, 0.0  ;;  %2414 = vst.msk [vmem:[%s3545_s22 + $0x188] sm:$0xf] %vm2315_vm3, %v2891_v48  ;;  %2348 = vst.msk [vmem:[%s3545_s22 + $0x80] sm:$0xf] %vm2315_vm3, %v2825_v49  ;;  %v1514_v61 = vmul.f32 %v3094_v57, %v3519_v6  ;;  %v1448_v62 = vmul.f32 %v3519_v6, %v1038_v58  ;;  %v1297_v13 = vpop.f32.mrb[39].mxu1 }
 0x13b   : > { %v2892_v59 = vpack.c.bf16 %v1774_v50, %v1774_v50  ;;  %v2826_v60 = vpack.c.bf16 %v1708_v51, %v1708_v51  ;;  %2412 = vst.msk [vmem:[%s3545_s22 + $0x180] sm:$0xf] %vm2315_vm3, %v2889_v53  ;;  %v1585_v2 = vadd.f32 %v3525_v8, %v1450_v56  ;;  %v1512_v3 = vmul.f32 %v3519_v6, %v1294_v63 }
 0x13c   : > { %2351 = vst.msk [vmem:[%s3545_s22 + $0x8c] sm:$0xf] %vm2315_vm3, %v2828_v54  ;;  %v2890_v1 = vpack.c.bf16 %v1772_v55, %v1772_v55  ;;  %v1451_v4 = vmul.f32 %v3031_v0, %v3519_v6  ;;  %v1649_v9 = vadd.f32 %v3525_v8, %v1514_v61  ;;  %v1583_v10 = vadd.f32 %v3525_v8, %v1448_v62 }
 0x13d   : > { %2415 = vst.msk [vmem:[%s3545_s22 + $0x18c] sm:$0xf] %vm2315_vm3, %v2892_v59  ;;  %2349 = vst.msk [vmem:[%s3545_s22 + $0x84] sm:$0xf] %vm2315_vm3, %v2826_v60  ;;  %v1515_v11 = vmul.f32 %v3095_v5, %v3519_v6  ;;  %v1449_v12 = vmul.f32 %v3519_v6, %v1041_v7  ;;  %v1713_v14 = vmax.f32 %v1585_v2, 0.0  ;;  %v1647_v15 = vadd.f32 %v3525_v8, %v1512_v3 }
 0x13e   : > { %2413 = vst.msk [vmem:[%s3545_s22 + $0x184] sm:$0xf] %vm2315_vm3, %v2890_v1  ;;  %v1586_v16 = vadd.f32 %v3525_v8, %v1451_v4  ;;  %v1513_v17 = vmul.f32 %v3519_v6, %v1297_v13  ;;  %v1777_v18 = vmax.f32 %v1649_v9, 0.0  ;;  %v1711_v19 = vmax.f32 %v1583_v10, 0.0  ;;  %v3034_v30 = vpop.f32.mrb[40].mxu0 }
 0x13f   : > { %v1650_v20 = vadd.f32 %v3525_v8, %v1515_v11  ;;  %v1584_v21 = vadd.f32 %v3525_v8, %v1449_v12  ;;  %v2831_v22 = vpack.c.bf16 %v1713_v14, %v1713_v14  ;;  %v1775_v23 = vmax.f32 %v1647_v15, 0.0  ;;  %v3098_v35 = vpop.f32.mrb[40].mxu1  ;;  %v1054_v36 = vpop.f32.mrb[41].mxu0  ;;  %v3869_v1 = vld [vmem:[%s4108_s3] ss:$0 sm:$0xff] }
 0x140   : > { %v1714_v24 = vmax.f32 %v1586_v16, 0.0  ;;  %v1648_v25 = vadd.f32 %v3525_v8, %v1513_v17  ;;  %v2895_v26 = vpack.c.bf16 %v1777_v18, %v1777_v18  ;;  %v2829_v27 = vpack.c.bf16 %v1711_v19, %v1711_v19  ;;  %v1310_v41 = vpop.f32.mrb[41].mxu1  ;;  %v3035_v42 = vpop.f32.mrb[42].mxu0  ;;  %v3877_v11 = vld [vmem:[%s4107_s2] ss:$0 sm:$0xff] }
 0x141   : > { %v1778_v28 = vmax.f32 %v1650_v20, 0.0  ;;  %v1712_v29 = vmax.f32 %v1584_v21, 0.0  ;;  %2354 = vst.msk [vmem:[%s3545_s22 + $0x98] sm:$0xf] %vm2315_vm3, %v2831_v22  ;;  %v2893_v31 = vpack.c.bf16 %v1775_v23, %v1775_v23  ;;  %v1454_v34 = vmul.f32 %v3034_v30, %v3519_v6  ;;  %v3099_v47 = vpop.f32.mrb[42].mxu1  ;;  %v1057_v48 = vpop.f32.mrb[43].mxu0 }
 0x142   : > { %v2832_v32 = vpack.c.bf16 %v1714_v24, %v1714_v24  ;;  %v1776_v33 = vmax.f32 %v1648_v25, 0.0  ;;  %2418 = vst.msk [vmem:[%s3545_s22 + $0x198] sm:$0xf] %vm2315_vm3, %v2895_v26  ;;  %2352 = vst.msk [vmem:[%s3545_s22 + $0x90] sm:$0xf] %vm2315_vm3, %v2829_v27  ;;  %v1518_v39 = vmul.f32 %v3098_v35, %v3519_v6  ;;  %v1452_v40 = vmul.f32 %v3519_v6, %v1054_v36  ;;  %v1313_v53 = vpop.f32.mrb[43].mxu1 }
 0x143   : > { %v2896_v37 = vpack.c.bf16 %v1778_v28, %v1778_v28  ;;  %v2830_v38 = vpack.c.bf16 %v1712_v29, %v1712_v29  ;;  %2416 = vst.msk [vmem:[%s3545_s22 + $0x190] sm:$0xf] %vm2315_vm3, %v2893_v31  ;;  %v1589_v44 = vadd.f32 %v3525_v8, %v1454_v34  ;;  %v1516_v45 = vmul.f32 %v3519_v6, %v1310_v41 }
 0x144   : > { %2355 = vst.msk [vmem:[%s3545_s22 + $0x9c] sm:$0xf] %vm2315_vm3, %v2832_v32  ;;  %v2894_v43 = vpack.c.bf16 %v1776_v33, %v1776_v33  ;;  %v1455_v46 = vmul.f32 %v3035_v42, %v3519_v6  ;;  %v1653_v49 = vadd.f32 %v3525_v8, %v1518_v39  ;;  %v1587_v50 = vadd.f32 %v3525_v8, %v1452_v40 }
 0x145   : > { %2419 = vst.msk [vmem:[%s3545_s22 + $0x19c] sm:$0xf] %vm2315_vm3, %v2896_v37  ;;  %2353 = vst.msk [vmem:[%s3545_s22 + $0x94] sm:$0xf] %vm2315_vm3, %v2830_v38  ;;  %v1519_v51 = vmul.f32 %v3099_v47, %v3519_v6  ;;  %v1453_v52 = vmul.f32 %v3519_v6, %v1057_v48  ;;  %v1717_v54 = vmax.f32 %v1589_v44, 0.0  ;;  %v1651_v55 = vadd.f32 %v3525_v8, %v1516_v45 }
 0x146   : > { %2417 = vst.msk [vmem:[%s3545_s22 + $0x194] sm:$0xf] %vm2315_vm3, %v2894_v43  ;;  %v1590_v56 = vadd.f32 %v3525_v8, %v1455_v46  ;;  %v1517_v57 = vmul.f32 %v3519_v6, %v1313_v53  ;;  %v1781_v58 = vmax.f32 %v1653_v49, 0.0  ;;  %v1715_v59 = vmax.f32 %v1587_v50, 0.0  ;;  %v3038_v7 = vpop.f32.mrb[44].mxu0 }
 0x147   : > { %v1654_v60 = vadd.f32 %v3525_v8, %v1519_v51  ;;  %v1588_v61 = vadd.f32 %v3525_v8, %v1453_v52  ;;  %v2835_v62 = vpack.c.bf16 %v1717_v54, %v1717_v54  ;;  %v1779_v63 = vmax.f32 %v1651_v55, 0.0  ;;  %v3102_v13 = vpop.f32.mrb[44].mxu1  ;;  %v1070_v14 = vpop.f32.mrb[45].mxu0 }
 0x148   : > { %v1718_v0 = vmax.f32 %v1590_v56, 0.0  ;;  %v1652_v2 = vadd.f32 %v3869_v1, %v1517_v57  ;;  %v2899_v3 = vpack.c.bf16 %v1781_v58, %v1781_v58  ;;  %v2833_v6 = vpack.c.bf16 %v1715_v59, %v1715_v59  ;;  %v1326_v19 = vpop.f32.mrb[45].mxu1  ;;  %v3039_v20 = vpop.f32.mrb[46].mxu0 }
 0x149   : > { %v1782_v4 = vmax.f32 %v1654_v60, 0.0  ;;  %v1716_v5 = vmax.f32 %v1588_v61, 0.0  ;;  %2358 = vst.msk [vmem:[%s3545_s22 + $0xa8] sm:$0xf] %vm2315_vm3, %v2835_v62  ;;  %v2897_v8 = vpack.c.bf16 %v1779_v63, %v1779_v63  ;;  %v1458_v12 = vmul.f32 %v3877_v11, %v3038_v7  ;;  %v3103_v25 = vpop.f32.mrb[46].mxu1  ;;  %v1073_v26 = vpop.f32.mrb[47].mxu0 }
 0x14a   : > { %v2836_v9 = vpack.c.bf16 %v1718_v0, %v1718_v0  ;;  %v1780_v10 = vmax.f32 %v1652_v2, 0.0  ;;  %2422 = vst.msk [vmem:[%s3545_s22 + $0x1a8] sm:$0xf] %vm2315_vm3, %v2899_v3  ;;  %2356 = vst.msk [vmem:[%s3545_s22 + $0xa0] sm:$0xf] %vm2315_vm3, %v2833_v6  ;;  %v1522_v17 = vmul.f32 %v3877_v11, %v3102_v13  ;;  %v1456_v18 = vmul.f32 %v3877_v11, %v1070_v14  ;;  %v1329_v31 = vpop.f32.mrb[47].mxu1 }
 0x14b   : > { %v2900_v15 = vpack.c.bf16 %v1782_v4, %v1782_v4  ;;  %v2834_v16 = vpack.c.bf16 %v1716_v5, %v1716_v5  ;;  %2420 = vst.msk [vmem:[%s3545_s22 + $0x1a0] sm:$0xf] %vm2315_vm3, %v2897_v8  ;;  %v1593_v22 = vadd.f32 %v3869_v1, %v1458_v12  ;;  %v1520_v23 = vmul.f32 %v3877_v11, %v1326_v19 }
 0x14c   : > { %2359 = vst.msk [vmem:[%s3545_s22 + $0xac] sm:$0xf] %vm2315_vm3, %v2836_v9  ;;  %v2898_v21 = vpack.c.bf16 %v1780_v10, %v1780_v10  ;;  %v1459_v24 = vmul.f32 %v3877_v11, %v3039_v20  ;;  %v1657_v27 = vadd.f32 %v3869_v1, %v1522_v17  ;;  %v1591_v28 = vadd.f32 %v3869_v1, %v1456_v18 }
 0x14d   : > { %2423 = vst.msk [vmem:[%s3545_s22 + $0x1ac] sm:$0xf] %vm2315_vm3, %v2900_v15  ;;  %2357 = vst.msk [vmem:[%s3545_s22 + $0xa4] sm:$0xf] %vm2315_vm3, %v2834_v16  ;;  %v1523_v29 = vmul.f32 %v3877_v11, %v3103_v25  ;;  %v1457_v30 = vmul.f32 %v3877_v11, %v1073_v26  ;;  %v1721_v32 = vmax.f32 %v1593_v22, 0.0  ;;  %v1655_v33 = vadd.f32 %v3869_v1, %v1520_v23 }
 0x14e   : > { %2421 = vst.msk [vmem:[%s3545_s22 + $0x1a4] sm:$0xf] %vm2315_vm3, %v2898_v21  ;;  %v1594_v34 = vadd.f32 %v3869_v1, %v1459_v24  ;;  %v1521_v35 = vmul.f32 %v3877_v11, %v1329_v31  ;;  %v1785_v36 = vmax.f32 %v1657_v27, 0.0  ;;  %v1719_v37 = vmax.f32 %v1591_v28, 0.0  ;;  %v3042_v48 = vpop.f32.mrb[48].mxu0 }
 0x14f   : > { %v1658_v38 = vadd.f32 %v3869_v1, %v1523_v29  ;;  %v1592_v39 = vadd.f32 %v3869_v1, %v1457_v30  ;;  %v2839_v40 = vpack.c.bf16 %v1721_v32, %v1721_v32  ;;  %v1783_v41 = vmax.f32 %v1655_v33, 0.0  ;;  %v3106_v53 = vpop.f32.mrb[48].mxu1  ;;  %v1086_v54 = vpop.f32.mrb[49].mxu0 }
 0x150   : > { %v1722_v42 = vmax.f32 %v1594_v34, 0.0  ;;  %v1656_v43 = vadd.f32 %v3869_v1, %v1521_v35  ;;  %v2903_v44 = vpack.c.bf16 %v1785_v36, %v1785_v36  ;;  %v2837_v45 = vpack.c.bf16 %v1719_v37, %v1719_v37  ;;  %v1342_v59 = vpop.f32.mrb[49].mxu1  ;;  %v3043_v60 = vpop.f32.mrb[50].mxu0 }
 0x151   : > { %v1786_v46 = vmax.f32 %v1658_v38, 0.0  ;;  %v1720_v47 = vmax.f32 %v1592_v39, 0.0  ;;  %2362 = vst.msk [vmem:[%s3545_s22 + $0xb8] sm:$0xf] %vm2315_vm3, %v2839_v40  ;;  %v2901_v49 = vpack.c.bf16 %v1783_v41, %v1783_v41  ;;  %v1462_v52 = vmul.f32 %v3877_v11, %v3042_v48  ;;  %v3107_v2 = vpop.f32.mrb[50].mxu1  ;;  %v1089_v3 = vpop.f32.mrb[51].mxu0 }
 0x152   : > { %v2840_v50 = vpack.c.bf16 %v1722_v42, %v1722_v42  ;;  %v1784_v51 = vmax.f32 %v1656_v43, 0.0  ;;  %2426 = vst.msk [vmem:[%s3545_s22 + $0x1b8] sm:$0xf] %vm2315_vm3, %v2903_v44  ;;  %2360 = vst.msk [vmem:[%s3545_s22 + $0xb0] sm:$0xf] %vm2315_vm3, %v2837_v45  ;;  %v1526_v57 = vmul.f32 %v3877_v11, %v3106_v53  ;;  %v1460_v58 = vmul.f32 %v3877_v11, %v1086_v54  ;;  %v1345_v8 = vpop.f32.mrb[51].mxu1 }
 0x153   : > { %v2904_v55 = vpack.c.bf16 %v1786_v46, %v1786_v46  ;;  %v2838_v56 = vpack.c.bf16 %v1720_v47, %v1720_v47  ;;  %2424 = vst.msk [vmem:[%s3545_s22 + $0x1b0] sm:$0xf] %vm2315_vm3, %v2901_v49  ;;  %v1597_v62 = vadd.f32 %v3869_v1, %v1462_v52  ;;  %v1524_v63 = vmul.f32 %v3877_v11, %v1342_v59 }
 0x154   : > { %2363 = vst.msk [vmem:[%s3545_s22 + $0xbc] sm:$0xf] %vm2315_vm3, %v2840_v50  ;;  %v2902_v61 = vpack.c.bf16 %v1784_v51, %v1784_v51  ;;  %v1463_v0 = vmul.f32 %v3877_v11, %v3043_v60  ;;  %v1661_v6 = vadd.f32 %v3869_v1, %v1526_v57  ;;  %v1595_v4 = vadd.f32 %v3869_v1, %v1460_v58 }
 0x155   : > { %2427 = vst.msk [vmem:[%s3545_s22 + $0x1bc] sm:$0xf] %vm2315_vm3, %v2904_v55  ;;  %2361 = vst.msk [vmem:[%s3545_s22 + $0xb4] sm:$0xf] %vm2315_vm3, %v2838_v56  ;;  %v1527_v5 = vmul.f32 %v3877_v11, %v3107_v2  ;;  %v1461_v7 = vmul.f32 %v3877_v11, %v1089_v3  ;;  %v1725_v9 = vmax.f32 %v1597_v62, 0.0  ;;  %v1659_v10 = vadd.f32 %v3869_v1, %v1524_v63 }
 0x156   : > { %2425 = vst.msk [vmem:[%s3545_s22 + $0x1b4] sm:$0xf] %vm2315_vm3, %v2902_v61  ;;  %v1598_v12 = vadd.f32 %v3869_v1, %v1463_v0  ;;  %v1525_v13 = vmul.f32 %v3877_v11, %v1345_v8  ;;  %v1789_v14 = vmax.f32 %v1661_v6, 0.0  ;;  %v1723_v15 = vmax.f32 %v1595_v4, 0.0  ;;  %v3046_v26 = vpop.f32.mrb[52].mxu0 }
 0x157   : > { %v1662_v16 = vadd.f32 %v3869_v1, %v1527_v5  ;;  %v1596_v17 = vadd.f32 %v3869_v1, %v1461_v7  ;;  %v2843_v18 = vpack.c.bf16 %v1725_v9, %v1725_v9  ;;  %v1787_v19 = vmax.f32 %v1659_v10, 0.0  ;;  %v3110_v31 = vpop.f32.mrb[52].mxu1  ;;  %v1102_v32 = vpop.f32.mrb[53].mxu0 }
 0x158   : > { %v1726_v20 = vmax.f32 %v1598_v12, 0.0  ;;  %v1660_v21 = vadd.f32 %v3869_v1, %v1525_v13  ;;  %v2907_v22 = vpack.c.bf16 %v1789_v14, %v1789_v14  ;;  %v2841_v23 = vpack.c.bf16 %v1723_v15, %v1723_v15  ;;  %v1358_v37 = vpop.f32.mrb[53].mxu1  ;;  %v3047_v38 = vpop.f32.mrb[54].mxu0 }
 0x159   : > { %v1790_v24 = vmax.f32 %v1662_v16, 0.0  ;;  %v1724_v25 = vmax.f32 %v1596_v17, 0.0  ;;  %2366 = vst.msk [vmem:[%s3545_s22 + $0xc8] sm:$0xf] %vm2315_vm3, %v2843_v18  ;;  %v2905_v27 = vpack.c.bf16 %v1787_v19, %v1787_v19  ;;  %v1466_v30 = vmul.f32 %v3877_v11, %v3046_v26  ;;  %v3111_v43 = vpop.f32.mrb[54].mxu1  ;;  %v1105_v44 = vpop.f32.mrb[55].mxu0 }
 0x15a   : > { %v2844_v28 = vpack.c.bf16 %v1726_v20, %v1726_v20  ;;  %v1788_v29 = vmax.f32 %v1660_v21, 0.0  ;;  %2430 = vst.msk [vmem:[%s3545_s22 + $0x1c8] sm:$0xf] %vm2315_vm3, %v2907_v22  ;;  %2364 = vst.msk [vmem:[%s3545_s22 + $0xc0] sm:$0xf] %vm2315_vm3, %v2841_v23  ;;  %v1530_v35 = vmul.f32 %v3877_v11, %v3110_v31  ;;  %v1464_v36 = vmul.f32 %v3877_v11, %v1102_v32  ;;  %v1361_v49 = vpop.f32.mrb[55].mxu1 }
 0x15b   : > { %v2908_v33 = vpack.c.bf16 %v1790_v24, %v1790_v24  ;;  %v2842_v34 = vpack.c.bf16 %v1724_v25, %v1724_v25  ;;  %2428 = vst.msk [vmem:[%s3545_s22 + $0x1c0] sm:$0xf] %vm2315_vm3, %v2905_v27  ;;  %v1601_v40 = vadd.f32 %v3869_v1, %v1466_v30  ;;  %v1528_v41 = vmul.f32 %v3877_v11, %v1358_v37 }
 0x15c   : > { %2367 = vst.msk [vmem:[%s3545_s22 + $0xcc] sm:$0xf] %vm2315_vm3, %v2844_v28  ;;  %v2906_v39 = vpack.c.bf16 %v1788_v29, %v1788_v29  ;;  %v1467_v42 = vmul.f32 %v3877_v11, %v3047_v38  ;;  %v1665_v45 = vadd.f32 %v3869_v1, %v1530_v35  ;;  %v1599_v46 = vadd.f32 %v3869_v1, %v1464_v36 }
 0x15d   : > { %2431 = vst.msk [vmem:[%s3545_s22 + $0x1cc] sm:$0xf] %vm2315_vm3, %v2908_v33  ;;  %2365 = vst.msk [vmem:[%s3545_s22 + $0xc4] sm:$0xf] %vm2315_vm3, %v2842_v34  ;;  %v1531_v47 = vmul.f32 %v3877_v11, %v3111_v43  ;;  %v1465_v48 = vmul.f32 %v3877_v11, %v1105_v44  ;;  %v1729_v50 = vmax.f32 %v1601_v40, 0.0  ;;  %v1663_v51 = vadd.f32 %v3869_v1, %v1528_v41 }
 0x15e   : > { %2429 = vst.msk [vmem:[%s3545_s22 + $0x1c4] sm:$0xf] %vm2315_vm3, %v2906_v39  ;;  %v1602_v52 = vadd.f32 %v3869_v1, %v1467_v42  ;;  %v1529_v53 = vmul.f32 %v3877_v11, %v1361_v49  ;;  %v1793_v54 = vmax.f32 %v1665_v45, 0.0  ;;  %v1727_v55 = vmax.f32 %v1599_v46, 0.0  ;;  %v3050_v3 = vpop.f32.mrb[56].mxu0 }
 0x15f   : > { %v1666_v56 = vadd.f32 %v3869_v1, %v1531_v47  ;;  %v1600_v57 = vadd.f32 %v3869_v1, %v1465_v48  ;;  %v2847_v58 = vpack.c.bf16 %v1729_v50, %v1729_v50  ;;  %v1791_v59 = vmax.f32 %v1663_v51, 0.0  ;;  %v3114_v8 = vpop.f32.mrb[56].mxu1  ;;  %v1118_v9 = vpop.f32.mrb[57].mxu0 }
 0x160   : > { %v1730_v60 = vmax.f32 %v1602_v52, 0.0  ;;  %v1664_v61 = vadd.f32 %v3869_v1, %v1529_v53  ;;  %v2911_v62 = vpack.c.bf16 %v1793_v54, %v1793_v54  ;;  %v2845_v63 = vpack.c.bf16 %v1727_v55, %v1727_v55  ;;  %v1374_v15 = vpop.f32.mrb[57].mxu1  ;;  %v3051_v16 = vpop.f32.mrb[58].mxu0 }
 0x161   : > { %v1794_v0 = vmax.f32 %v1666_v56, 0.0  ;;  %v1728_v2 = vmax.f32 %v1600_v57, 0.0  ;;  %2370 = vst.msk [vmem:[%s3545_s22 + $0xd8] sm:$0xf] %vm2315_vm3, %v2847_v58  ;;  %v2909_v6 = vpack.c.bf16 %v1791_v59, %v1791_v59  ;;  %v1470_v7 = vmul.f32 %v3877_v11, %v3050_v3  ;;  %v3115_v21 = vpop.f32.mrb[58].mxu1  ;;  %v1121_v22 = vpop.f32.mrb[59].mxu0 }
 0x162   : > { %v2848_v4 = vpack.c.bf16 %v1730_v60, %v1730_v60  ;;  %v1792_v5 = vmax.f32 %v1664_v61, 0.0  ;;  %2434 = vst.msk [vmem:[%s3545_s22 + $0x1d8] sm:$0xf] %vm2315_vm3, %v2911_v62  ;;  %2368 = vst.msk [vmem:[%s3545_s22 + $0xd0] sm:$0xf] %vm2315_vm3, %v2845_v63  ;;  %v1534_v13 = vmul.f32 %v3877_v11, %v3114_v8  ;;  %v1468_v14 = vmul.f32 %v3877_v11, %v1118_v9  ;;  %v1377_v27 = vpop.f32.mrb[59].mxu1 }
 0x163   : > { %v2912_v10 = vpack.c.bf16 %v1794_v0, %v1794_v0  ;;  %v2846_v12 = vpack.c.bf16 %v1728_v2, %v1728_v2  ;;  %2432 = vst.msk [vmem:[%s3545_s22 + $0x1d0] sm:$0xf] %vm2315_vm3, %v2909_v6  ;;  %v1605_v18 = vadd.f32 %v3869_v1, %v1470_v7  ;;  %v1532_v19 = vmul.f32 %v3877_v11, %v1374_v15 }
 0x164   : > { %2371 = vst.msk [vmem:[%s3545_s22 + $0xdc] sm:$0xf] %vm2315_vm3, %v2848_v4  ;;  %v2910_v17 = vpack.c.bf16 %v1792_v5, %v1792_v5  ;;  %v1471_v20 = vmul.f32 %v3877_v11, %v3051_v16  ;;  %v1669_v23 = vadd.f32 %v3869_v1, %v1534_v13  ;;  %v1603_v24 = vadd.f32 %v3869_v1, %v1468_v14 }
 0x165   : > { %2435 = vst.msk [vmem:[%s3545_s22 + $0x1dc] sm:$0xf] %vm2315_vm3, %v2912_v10  ;;  %2369 = vst.msk [vmem:[%s3545_s22 + $0xd4] sm:$0xf] %vm2315_vm3, %v2846_v12  ;;  %v1535_v25 = vmul.f32 %v3877_v11, %v3115_v21  ;;  %v1469_v26 = vmul.f32 %v3877_v11, %v1121_v22  ;;  %v1733_v28 = vmax.f32 %v1605_v18, 0.0  ;;  %v1667_v29 = vadd.f32 %v3869_v1, %v1532_v19 }
 0x166   : > { %2433 = vst.msk [vmem:[%s3545_s22 + $0x1d4] sm:$0xf] %vm2315_vm3, %v2910_v17  ;;  %v1606_v30 = vadd.f32 %v3869_v1, %v1471_v20  ;;  %v1533_v31 = vmul.f32 %v3877_v11, %v1377_v27  ;;  %v1797_v32 = vmax.f32 %v1669_v23, 0.0  ;;  %v1731_v33 = vmax.f32 %v1603_v24, 0.0  ;;  %v3054_v44 = vpop.f32.mrb[60].mxu0 }
 0x167   : > { %v1670_v34 = vadd.f32 %v3869_v1, %v1535_v25  ;;  %v1604_v35 = vadd.f32 %v3869_v1, %v1469_v26  ;;  %v2851_v36 = vpack.c.bf16 %v1733_v28, %v1733_v28  ;;  %v1795_v37 = vmax.f32 %v1667_v29, 0.0  ;;  %v3118_v49 = vpop.f32.mrb[60].mxu1  ;;  %v1134_v50 = vpop.f32.mrb[61].mxu0 }
 0x168   : > { %v1734_v38 = vmax.f32 %v1606_v30, 0.0  ;;  %v1668_v39 = vadd.f32 %v3869_v1, %v1533_v31  ;;  %v2915_v40 = vpack.c.bf16 %v1797_v32, %v1797_v32  ;;  %v2849_v41 = vpack.c.bf16 %v1731_v33, %v1731_v33  ;;  %v1390_v55 = vpop.f32.mrb[61].mxu1  ;;  %v3055_v56 = vpop.f32.mrb[62].mxu0 }
 0x169   : > { %v1798_v42 = vmax.f32 %v1670_v34, 0.0  ;;  %v1732_v43 = vmax.f32 %v1604_v35, 0.0  ;;  %2374 = vst.msk [vmem:[%s3545_s22 + $0xe8] sm:$0xf] %vm2315_vm3, %v2851_v36  ;;  %v2913_v45 = vpack.c.bf16 %v1795_v37, %v1795_v37  ;;  %v1474_v48 = vmul.f32 %v3877_v11, %v3054_v44  ;;  %v3119_v61 = vpop.f32.mrb[62].mxu1  ;;  %v1137_v62 = vpop.f32.mrb[63].mxu0 }
 0x16a   : > { %v2852_v46 = vpack.c.bf16 %v1734_v38, %v1734_v38  ;;  %v1796_v47 = vmax.f32 %v1668_v39, 0.0  ;;  %2438 = vst.msk [vmem:[%s3545_s22 + $0x1e8] sm:$0xf] %vm2315_vm3, %v2915_v40  ;;  %2372 = vst.msk [vmem:[%s3545_s22 + $0xe0] sm:$0xf] %vm2315_vm3, %v2849_v41  ;;  %v1538_v53 = vmul.f32 %v3877_v11, %v3118_v49  ;;  %v1472_v54 = vmul.f32 %v3877_v11, %v1134_v50  ;;  %v1393_v6 = vpop.f32.mrb[63].mxu1 }
 0x16b   : > { %v2916_v51 = vpack.c.bf16 %v1798_v42, %v1798_v42  ;;  %v2850_v52 = vpack.c.bf16 %v1732_v43, %v1732_v43  ;;  %2436 = vst.msk [vmem:[%s3545_s22 + $0x1e0] sm:$0xf] %vm2315_vm3, %v2913_v45  ;;  %v1609_v58 = vadd.f32 %v3869_v1, %v1474_v48  ;;  %v1536_v59 = vmul.f32 %v3877_v11, %v1390_v55 }
 0x16c   : > { %2375 = vst.msk [vmem:[%s3545_s22 + $0xec] sm:$0xf] %vm2315_vm3, %v2852_v46  ;;  %v2914_v57 = vpack.c.bf16 %v1796_v47, %v1796_v47  ;;  %v1475_v60 = vmul.f32 %v3877_v11, %v3055_v56  ;;  %v1673_v63 = vadd.f32 %v3869_v1, %v1538_v53  ;;  %v1607_v0 = vadd.f32 %v3869_v1, %v1472_v54 }
 0x16d   : > { %2439 = vst.msk [vmem:[%s3545_s22 + $0x1ec] sm:$0xf] %vm2315_vm3, %v2916_v51  ;;  %2373 = vst.msk [vmem:[%s3545_s22 + $0xe4] sm:$0xf] %vm2315_vm3, %v2850_v52  ;;  %v1539_v2 = vmul.f32 %v3877_v11, %v3119_v61  ;;  %v1473_v3 = vmul.f32 %v3877_v11, %v1137_v62  ;;  %v1737_v4 = vmax.f32 %v1609_v58, 0.0  ;;  %v1671_v5 = vadd.f32 %v3869_v1, %v1536_v59 }
 0x16e   : > { %2437 = vst.msk [vmem:[%s3545_s22 + $0x1e4] sm:$0xf] %vm2315_vm3, %v2914_v57  ;;  %v1610_v7 = vadd.f32 %v3869_v1, %v1475_v60  ;;  %v1537_v8 = vmul.f32 %v3877_v11, %v1393_v6  ;;  %v1801_v9 = vmax.f32 %v1673_v63, 0.0  ;;  %v1735_v10 = vmax.f32 %v1607_v0, 0.0 }
 0x16f   : > { %v1674_v12 = vadd.f32 %v3869_v1, %v1539_v2  ;;  %v1608_v13 = vadd.f32 %v3869_v1, %v1473_v3  ;;  %v2855_v14 = vpack.c.bf16 %v1737_v4, %v1737_v4  ;;  %v1799_v15 = vmax.f32 %v1671_v5, 0.0 }
 0x170   : > { %v1738_v16 = vmax.f32 %v1610_v7, 0.0  ;;  %v1672_v17 = vadd.f32 %v3869_v1, %v1537_v8  ;;  %v2919_v18 = vpack.c.bf16 %v1801_v9, %v1801_v9  ;;  %v2853_v19 = vpack.c.bf16 %v1735_v10, %v1735_v10 }
 0x171   : > { %v1802_v11 = vmax.f32 %v1674_v12, 0.0  ;;  %v1736_v20 = vmax.f32 %v1608_v13, 0.0  ;;  %2378 = vst.msk [vmem:[%s3545_s22 + $0xf8] sm:$0xf] %vm2315_vm3, %v2855_v14  ;;  %v2917_v21 = vpack.c.bf16 %v1799_v15, %v1799_v15 }
 0x172   : > { %v2856_v22 = vpack.c.bf16 %v1738_v16, %v1738_v16  ;;  %v1800_v23 = vmax.f32 %v1672_v17, 0.0  ;;  %2442 = vst.msk [vmem:[%s3545_s22 + $0x1f8] sm:$0xf] %vm2315_vm3, %v2919_v18  ;;  %2376 = vst.msk [vmem:[%s3545_s22 + $0xf0] sm:$0xf] %vm2315_vm3, %v2853_v19 }
 0x173   : > { %v2920_v1 = vpack.c.bf16 %v1802_v11, %v1802_v11  ;;  %v2854_v24 = vpack.c.bf16 %v1736_v20, %v1736_v20  ;;  %2440 = vst.msk [vmem:[%s3545_s22 + $0x1f0] sm:$0xf] %vm2315_vm3, %v2917_v21 }
 0x174   : > { %2379 = vst.msk [vmem:[%s3545_s22 + $0xfc] sm:$0xf] %vm2315_vm3, %v2856_v22  ;;  %v2918_v25 = vpack.c.bf16 %v1800_v23, %v1800_v23 }
 0x175   : > { %2443 = vst.msk [vmem:[%s3545_s22 + $0x1fc] sm:$0xf] %vm2315_vm3, %v2920_v1  ;;  %2377 = vst.msk [vmem:[%s3545_s22 + $0xf4] sm:$0xf] %vm2315_vm3, %v2854_v24 }
 0x176   : > { %2441 = vst.msk [vmem:[%s3545_s22 + $0x1f4] sm:$0xf] %vm2315_vm3, %v2918_v25 }
 0x177   : > { %3247 = shalt.err (!%p3244_p3)
}
 0x178   : > { %s3248_s12 = scalar_lea.hbm %s4048_s7, 8192  ;;  %s3252_s22 = scalar_lea.hbm %s4109_s4, 16384 }
 0x179   : > { %p3249_p4 = scmp.ne.s32.totalorder %s4048_s7, %s3248_s12  ;;  %p3253_p9 = scmp.lt.u32.totalorder %s4048_s7, %s4109_s4 }
 0x17a   : > { %p3254_p10 = scmp.lt.u32.totalorder %s3252_s22, %s3248_s12  ;;  %p3256_p12 = scmp.lt.u32.totalorder %s3248_s12, %s4048_s7 }
 0x17b   : > { %p3250_p7 = pnand %p3249_p4, %p3365_p5 }
 0x17c   : > { %p3255_p11 = por %p3254_p10, %p3253_p9 }
 0x17d   : > { %p3251_p8 = pneg %p3250_p7 }
 0x17e   : > { %p3257_p13 = por %p3256_p12, %p3255_p11 }
 0x180   : > { %p3258_p0 = pnand %p3257_p13, %p3251_p8 }
 0x182   : > { %3261 = shalt.err (!%p3258_p0)
}
 0x183   : > { %s3300_s28 = smov 64   ;;  %s3301_s29 = smov 4  }
 0x184   : > { %3124 = dma.vmem_to_hbm [thread:$0]  (%p3365_p5), %s4050_s5, 8192, %s4048_s7, %s4064_s8, %s3300_s28, %s3300_s28, %s3301_s29  }
 0x185 PF: > { %p3130_p1 = scmp.ge.s32.totalorder %s3296_s18, 2  ;;  %s2473_s30 = sand.u32 1, %s3284_s15  }
 0x186   : > { %s2474_s19 = scalar_lea.sflag [#allocation3], %s2473_s30 }
 0x187   : > { %p3127_p2 = pnand %p3130_p1, %p3369_p6 }
 0x189   : > { %3279 = dma.done.wait (!%p3127_p2), %s2474_s19, 8192  }
 0x18a   : > { %3281 = vsyncadd (!%p3127_p2), %s2474_s19, 4294959104  ;;  %p14_p3 = scmp.ge.s32.totalorder %s3352_s21, 4   ;;  %s4112_s15 = smov %s3288_s16 }
 0x18b   : > { %s4113_s16 = smov %s3292_s17  ;;  %s4114_s17 = smov %s3363_s24 }
 0x18c   : > { %s4115_s18 = smov %s3352_s21  ;;  %16 = sbr.rel (!%p14_p3) target bundleno = 3 (0x3), region = 71 }
 0x193   :  { %2479 = vsyncpa [#allocation3], 1 }
 0x194   :  { %2481 = vsyncpa [#allocation3 + $0x1], 1 }

</bundles_post_ra>
